<compile_context>
chip_gen: v6e
topology: v6e:2x2x1
jax: 0.10.0
libtpu: 0.0.40
codegen_flags: <defaults>
</compile_context>

<pallas_src>
import functools

import jax
import jax.numpy as jnp
from jax import lax
from jax.experimental import pallas as pl
from jax.experimental.pallas import tpu as pltpu


def _sr_upsample_kernel(x_ref, w_ref, b_ref, o_ref):
    """One (batch, row-tile) grid step: conv-as-matmul + bias + ReLU.

    x_ref : (1, TM, K)  im2col'd input rows, bf16   (K = 9*C_in)
    w_ref : (K, CO)     conv weights, bf16          (CO = C_in*scale^2, lane-dense)
    b_ref : (1, CO)     conv bias, f32
    o_ref : (1, TM, CO) conv + bias + ReLU rows (pre-PixelShuffle), f32
    """
    acc = jnp.dot(x_ref[0], w_ref[...], preferred_element_type=jnp.float32)
    o_ref[0] = jnp.maximum(acc + b_ref[...], 0.0).astype(o_ref.dtype)


def sr_upsample_forward(x_nchw, weight, bias, *, scale=2):
    """SRUpsample forward.

    x_nchw : (N, C_in, H, W) float32
    weight : (C_out, C_in, 3, 3) with C_out = C_in * scale^2  (PyTorch layout)
    bias   : (C_out,)
    returns: (N, C_in, H*scale, W*scale) float32
    """
    N, C, H, W = x_nchw.shape
    CO = C * scale * scale
    assert weight.shape == (CO, C, 3, 3) and bias.shape == (CO,)

    HW = H * W
    K = 9 * C

    # Row tile along the flattened H*W axis (matmul M dim): one step per batch
    # element when the whole image fits (M = HW), otherwise tile in multiples
    # of 8 up to 1024 rows.
    if HW <= 1024:
        TM = HW
    else:
        TM = HW
        for cand in (1024, 512, 256, 128, 64, 32, 16, 8):
            if HW % cand == 0:
                TM = cand
                break
    nT = HW // TM

    # torch weight (CO, Cin, kh, kw) -> (kh, kw, Cin, CO) -> (9*Cin, CO), bf16.
    # Matches x_cols channel order (dy*3 + dx)*C + c below.
    w_k = jnp.transpose(weight, (2, 3, 1, 0)).reshape(K, CO).astype(jnp.bfloat16)
    b_k = bias.reshape(1, CO).astype(jnp.float32)

    # One-time im2col in XLA: NCHW -> NHWC bf16, zero-pad H/W by 1 ("same"
    # 3x3 conv), fold all nine taps into the channel (contraction) dim.
    x_nhwc = jnp.transpose(x_nchw, (0, 2, 3, 1)).astype(jnp.bfloat16)
    x_pad = jnp.pad(x_nhwc, ((0, 0), (1, 1), (1, 1), (0, 0)))
    cols = [x_pad[:, dy:dy + H, dx:dx + W, :] for dy in range(3) for dx in range(3)]
    x_cols = jnp.concatenate(cols, axis=-1).reshape(N, HW, K)

    y = pl.pallas_call(
        _sr_upsample_kernel,
        out_shape=jax.ShapeDtypeStruct((N, HW, CO), jnp.float32),
        grid_spec=pltpu.PrefetchScalarGridSpec(
            num_scalar_prefetch=0,
            grid=(N, nT),
            in_specs=[
                pl.BlockSpec((1, TM, K), lambda n, t: (n, t, 0)),
                pl.BlockSpec((K, CO), lambda n, t: (0, 0)),   # resident across steps
                pl.BlockSpec((1, CO), lambda n, t: (0, 0)),   # resident across steps
            ],
            out_specs=pl.BlockSpec((1, TM, CO), lambda n, t: (n, t, 0)),
        ),
        compiler_params=pltpu.CompilerParams(
            dimension_semantics=("parallel", "parallel")),
    )(x_cols, w_k, b_k)

    # PixelShuffle(scale) + NHWC->NCHW collapsed into a single transpose:
    #   y[n, h*W+w, c*r*r + i*r + j] -> out[n, c, h*r + i, w*r + j]
    r = scale
    y = y.reshape(N, H, W, C, r, r)
    out = jnp.transpose(y, (0, 3, 1, 4, 2, 5)).reshape(N, C, H * r, W * r)
    return out


def _reference(x_nchw, weight, bias, *, scale=2):
    """Pure-JAX reference: Conv2d(3x3, pad=1, bias) -> PixelShuffle -> ReLU.
    Inputs rounded to bf16 (matching the kernel's MXU operands), f32 accumulate."""
    xb = x_nchw.astype(jnp.bfloat16).astype(jnp.float32)
    wb = weight.astype(jnp.bfloat16).astype(jnp.float32)
    y = lax.conv_general_dilated(
        xb, wb, (1, 1), ((1, 1), (1, 1)),
        dimension_numbers=("NCHW", "OIHW", "NCHW"),
        precision=lax.Precision.HIGHEST)
    y = y + bias[None, :, None, None]
    N, CO, H, W = y.shape
    r = scale
    C = CO // (r * r)
    y = y.reshape(N, C, r, r, H, W)
    y = jnp.transpose(y, (0, 1, 4, 2, 5, 3)).reshape(N, C, H * r, W * r)
    return jnp.maximum(y, 0.0)


if __name__ == "__main__":
    # TODO(synk): Conv3x3 / relu() definitions are not shown in the snippet;
    # assumed Conv2d(kernel=3, stride=1, padding=1, bias=True) and nn.ReLU.
    key = jax.random.PRNGKey(0)
    k_x, k_w, k_b = jax.random.split(key, 3)

    N, C, H, W, scale = 2, 64, 16, 16, 2     # module defaults: in_ch=64, scale=2
    CO = C * scale * scale

    x = jax.random.normal(k_x, (N, C, H, W), jnp.float32)
    weight = jax.random.normal(k_w, (CO, C, 3, 3), jnp.float32) * (2.0 / (C * 9)) ** 0.5
    bias = 0.01 * jax.random.normal(k_b, (CO,), jnp.float32)

    out = jax.jit(functools.partial(sr_upsample_forward, scale=scale))(x, weight, bias)
    out = jax.block_until_ready(out)

    ref = _reference(x, weight, bias, scale=scale)
    assert out.shape == (N, C, H * scale, W * scale)
    err = float(jnp.max(jnp.abs(out - ref)))
    assert jnp.allclose(out, ref, atol=2e-3, rtol=2e-3), f"max abs err {err}"

    print("KERNEL_OK")
</pallas_src>

<mosaic_0001>
module attributes {stable_mosaic.version = 11 : i64} {
  func.func @_sr_upsample_kernel(%arg0: i32, %arg1: i32, %arg2: memref<1x256x576xbf16, #tpu.memory_space<vmem>>, %arg3: memref<576x256xbf16, #tpu.memory_space<vmem>>, %arg4: memref<1x256xf32, #tpu.memory_space<vmem>>, %arg5: memref<1x256x256xf32, #tpu.memory_space<vmem>>) attributes {dimension_semantics = [#tpu.dimension_semantics<parallel>, #tpu.dimension_semantics<parallel>], iteration_bounds = array<i64: 2, 1>, scalar_prefetch = 0 : i64, scratch_operands = 0 : i64, tpu.core_type = #tpu.core_type<tc>, window_params = [{transform_indices = @transform_0, window_bounds = array<i64: 1, 256, 576>}, {pipeline_mode = #tpu.pipeline_mode<synchronous>, transform_indices = @transform_1, window_bounds = array<i64: 576, 256>}, {pipeline_mode = #tpu.pipeline_mode<synchronous>, transform_indices = @transform_2, window_bounds = array<i64: 1, 256>}, {transform_indices = @transform_3, window_bounds = array<i64: 1, 256, 256>}]} {
    %c0 = arith.constant 0 : index
    %c0_0 = arith.constant 0 : index
    %c0_1 = arith.constant 0 : index
    %0 = vector.load %arg2[%c0, %c0_0, %c0_1] : memref<1x256x576xbf16, #tpu.memory_space<vmem>>, vector<1x256x576xbf16>
    %1 = vector.shape_cast %0 : vector<1x256x576xbf16> to vector<256x576xbf16>
    %c0_2 = arith.constant 0 : index
    %c0_3 = arith.constant 0 : index
    %2 = vector.load %arg3[%c0_2, %c0_3] : memref<576x256xbf16, #tpu.memory_space<vmem>>, vector<576x256xbf16>
    %cst = arith.constant dense<0.000000e+00> : vector<256x256xf32>
    %3 = tpu.matmul %1, %2, %cst {dimension_numbers = #tpu.dot_dimension_numbers<[1], [0], [0], [1], [0, 0, 1, 1], [], []>} : vector<256x576xbf16>, vector<576x256xbf16>, vector<256x256xf32> -> vector<256x256xf32>
    %c0_4 = arith.constant 0 : index
    %c0_5 = arith.constant 0 : index
    %4 = vector.load %arg4[%c0_4, %c0_5] : memref<1x256xf32, #tpu.memory_space<vmem>>, vector<1x256xf32>
    %5 = vector.broadcast %4 : vector<1x256xf32> to vector<256x256xf32>
    %6 = arith.addf %3, %5 : vector<256x256xf32>
    %cst_6 = arith.constant 0.000000e+00 : f32
    %7 = vector.broadcast %cst_6 : f32 to vector<256x256xf32>
    %8 = arith.maximumf %6, %7 : vector<256x256xf32>
    %c0_7 = arith.constant 0 : index
    %c0_8 = arith.constant 0 : index
    %c0_9 = arith.constant 0 : index
    %9 = vector.load %arg5[%c0_7, %c0_8, %c0_9] : memref<1x256x256xf32, #tpu.memory_space<vmem>>, vector<1x256x256xf32>
    %10 = vector.shape_cast %9 : vector<1x256x256xf32> to vector<256x256xf32>
    %11 = vector.shape_cast %8 : vector<256x256xf32> to vector<1x256x256xf32>
    tpu.vector_store %arg5[%c0_7, %c0_8, %c0_9], %11 {strides = array<i32>} : memref<1x256x256xf32, #tpu.memory_space<vmem>>, vector<1x256x256xf32>,
    return
  }
  func.func @transform_0(%arg0: i32, %arg1: i32) -> (i32, i32, i32) {
    %c0_i32 = arith.constant 0 : i32
    %c0_i32_0 = arith.constant 0 : i32
    return %arg0, %arg1, %c0_i32 : i32, i32, i32
  }
  func.func @transform_1(%arg0: i32, %arg1: i32) -> (i32, i32) {
    %c0_i32 = arith.constant 0 : i32
    %c0_i32_0 = arith.constant 0 : i32
    %c0_i32_1 = arith.constant 0 : i32
    return %c0_i32, %c0_i32_0 : i32, i32
  }
  func.func @transform_2(%arg0: i32, %arg1: i32) -> (i32, i32) {
    %c0_i32 = arith.constant 0 : i32
    %c0_i32_0 = arith.constant 0 : i32
    %c0_i32_1 = arith.constant 0 : i32
    return %c0_i32, %c0_i32_0 : i32, i32
  }
  func.func @transform_3(%arg0: i32, %arg1: i32) -> (i32, i32, i32) {
    %c0_i32 = arith.constant 0 : i32
    %c0_i32_0 = arith.constant 0 : i32
    return %arg0, %arg1, %c0_i32 : i32, i32, i32
  }
}

</mosaic_0001>

<bundles_post_ra>
// kernel: sr_upsample_forward.1
= control target key start
LH: loop header
LB: loop body
LE: loop exit
PB: predicated region body
PF: predicated region fallthrough
CT: control target
= control target key end

     0   :  { %s2510_s12 = smov 0   ;;  %s2512_s13 = smov 0   ;;  %s3210_s0 = inlined_call_operand.vmem [shape: bf16[2,256,576], index: 0, kind: input, shape index: {}]   ;;  %s3211_s1 = inlined_call_operand.vmem [shape: bf16[576,256], index: 1, kind: input, shape index: {}]   ;;  %s3212_s2 = inlined_call_operand.vmem [shape: f32[1,256], index: 2, kind: input, shape index: {}]   ;;  %s3213_s3 = inlined_call_operand.vmem [shape: f32[2,256,256], index: 3, kind: output, shape index: {}]  }
   0x1   :  { %s2514_s14 = smov 0  }
   0x2 LB: > { %s25_s15 = sadd.s32 1, %s2483_s13  ;;  %p2012_p0 = scmp.ge.s32.totalorder %s2487_s14, 1  ;;  %s2487_s14 = sphi %s2514_s14, %s13_s14   ;;  %s2483_s13 = sphi %s2512_s13, %s3251_s13   ;;  %s2479_s12 = sphi %s2510_s12, %s3250_s12  }
   0x3   : > { %p27_p1 = scmp.ge.s32.totalorder %s25_s15, 2  ;;  %p159_p2 = scmp.lt.s32.totalorder %s2487_s14, 3 }
   0x5   : > { %s3253_s15 = smov (%p27_p1, %s25_s15), 0  ;;  %p160_p3 = pnand %p2012_p0, %p159_p2 }
   0x7   : > { %163 = sbr.rel (%p160_p3) target bundleno = 467 (0x1d3), region = 32 }
   0xc   : > { %v2245_v0 = vld [vmem:[%s3211_s1 + $0x74] ss:$8 sps:$4 sm:$0xff]   ;;  %v2247_v1 = vld [vmem:[%s3211_s1 + $0x70] ss:$8 sps:$4 sm:$0xff]   ;;  %v2248_v2 = vld [vmem:[%s3211_s1 + $0x64] ss:$8 sps:$4 sm:$0xff]  }
   0xd   : > { %1205 = vmatprep.subr.bf16.mxu0 %v2245_v0  ;;  %2187 = vmatprep.subr.bf16.mxu1 %v2245_v0  ;;  %v2250_v3 = vld [vmem:[%s3211_s1 + $0x60] ss:$8 sps:$4 sm:$0xff]   ;;  %v2251_v4 = vld [vmem:[%s3211_s1 + $0x54] ss:$8 sps:$4 sm:$0xff]   ;;  %v2253_v5 = vld [vmem:[%s3211_s1 + $0x50] ss:$8 sps:$4 sm:$0xff]  }
   0xe   : > { %1206 = vmatpush1.bf16.msra.mxu0 %v2247_v1  ;;  %2203 = vmatpush1.bf16.msra.mxu1 %v2247_v1  ;;  %p194_p4 = scmp.lt.s32.totalorder %s2479_s12, 1  ;;  %v2254_v6 = vld [vmem:[%s3211_s1 + $0x44] ss:$8 sps:$4 sm:$0xff]   ;;  %v2256_v7 = vld [vmem:[%s3211_s1 + $0x40] ss:$8 sps:$4 sm:$0xff]   ;;  %vm1156_vm0 = vcmask 523264  }
   0xf   : > { %1207 = vmatprep.subr.bf16.mxu0 %v2248_v2  ;;  %2188 = vmatprep.subr.bf16.mxu1 %v2248_v2  ;;  %v2257_v8 = vld [vmem:[%s3211_s1 + $0x34] ss:$8 sps:$4 sm:$0xff]   ;;  %v2259_v9 = vld [vmem:[%s3211_s1 + $0x30] ss:$8 sps:$4 sm:$0xff]   ;;  %v2260_v10 = vld [vmem:[%s3211_s1 + $0x24] ss:$8 sps:$4 sm:$0xff]  }
  0x10   : > { %s3255_s12 = smov (!%p194_p4, %s2479_s12), 1  ;;  %v2262_v11 = vld [vmem:[%s3211_s1 + $0x20] ss:$8 sps:$4 sm:$0xff]   ;;  %v2263_v12 = vld [vmem:[%s3211_s1 + $0x14] ss:$8 sps:$4 sm:$0xff]  }
  0x11   : > { %s2219_s9 = smul.u32 640, %s3255_s12  ;;  %v2265_v14 = vld [vmem:[%s3211_s1 + $0x10] ss:$8 sps:$4 sm:$0xff]   ;;  %v2266_v16 = vld [vmem:[%s3211_s1 + $0x4] ss:$8 sps:$4 sm:$0xff]  }
  0x12   : > { %1208 = vmatpush1.bf16.msra.mxu0 %v2250_v3  ;;  %2204 = vmatpush1.bf16.msra.mxu1 %v2250_v3  ;;  %v2268_v17 = vld [vmem:[%s3211_s1] ss:$8 sps:$4 sm:$0xff]   ;;  %v2269_v18 = vld [vmem:[%s3211_s1 + $0xf4] ss:$8 sps:$4 sm:$0xff]   ;;  %v2271_v19 = vld [vmem:[%s3211_s1 + $0xf0] ss:$8 sps:$4 sm:$0xff]  }
  0x13   : > { %1209 = vmatprep.subr.bf16.mxu0 %v2251_v4  ;;  %2189 = vmatprep.subr.bf16.mxu1 %v2251_v4  ;;  %s2574_s20 = scalar_lea.vmem %s3210_s0, %s2219_s9  ;;  %v2272_v20 = vld [vmem:[%s3211_s1 + $0xe4] ss:$8 sps:$4 sm:$0xff]   ;;  %v2274_v21 = vld [vmem:[%s3211_s1 + $0xe0] ss:$8 sps:$4 sm:$0xff]   ;;  %v2275_v22 = vld [vmem:[%s3211_s1 + $0xd4] ss:$8 sps:$4 sm:$0xff]  }
  0x14   : > { %v2295_v13 = vld [vmem:[%s2574_s20 + $0x4] ss:$20 sps:$4 sm:$0xff]   ;;  %v2280_v25 = vld [vmem:[%s3211_s1 + $0xc0] ss:$8 sps:$4 sm:$0xff]   ;;  %v2281_v26 = vld [vmem:[%s3211_s1 + $0xb4] ss:$8 sps:$4 sm:$0xff]  }
  0x15   : > { %v2298_v15 = vld [vmem:[%s2574_s20 + $0x144] ss:$20 sps:$4 sm:$0xff]   ;;  %1237 = vmatprep.mubr.bf16.mxu0 %v2295_v13  ;;  %v2286_v29 = vld [vmem:[%s3211_s1 + $0xa0] ss:$8 sps:$4 sm:$0xff]   ;;  %v2287_v30 = vld [vmem:[%s3211_s1 + $0x94] ss:$8 sps:$4 sm:$0xff]  }
  0x16   : > { %1210 = vmatpush1.bf16.msra.mxu0 %v2253_v5  ;;  %2205 = vmatpush1.bf16.msra.mxu1 %v2253_v5  ;;  %v2277_v23 = vld [vmem:[%s3211_s1 + $0xd0] ss:$8 sps:$4 sm:$0xff]   ;;  %v2278_v24 = vld [vmem:[%s3211_s1 + $0xc4] ss:$8 sps:$4 sm:$0xff]   ;;  %v2292_v33 = vld [vmem:[%s3211_s1 + $0x80] ss:$8 sps:$4 sm:$0xff]  }
  0x17   : > { %1211 = vmatprep.subr.bf16.mxu0 %v2254_v6  ;;  %2190 = vmatprep.subr.bf16.mxu1 %v2254_v6  ;;  %v2283_v27 = vld [vmem:[%s3211_s1 + $0xb0] ss:$8 sps:$4 sm:$0xff]   ;;  %v2284_v28 = vld [vmem:[%s3211_s1 + $0xa4] ss:$8 sps:$4 sm:$0xff]   ;;  %v2301_v34 = vld [vmem:[%s3211_s1 + $0x174] ss:$8 sps:$4 sm:$0xff]  }
  0x18   : > { %1317 = vmatprep.mubr.bf16.mxu1 %v2298_v15  ;;  %v2289_v31 = vld [vmem:[%s3211_s1 + $0x90] ss:$8 sps:$4 sm:$0xff]   ;;  %v2290_v32 = vld [vmem:[%s3211_s1 + $0x84] ss:$8 sps:$4 sm:$0xff]   ;;  %v2293_v35 = vld [vmem:[%s2574_s20] ss:$20 sps:$4 sm:$0xff]  }
  0x19   : > { %v2304_v36 = vld [vmem:[%s3211_s1 + $0x234] ss:$8 sps:$4 sm:$0xff]   ;;  %v2299_v38 = vld [vmem:[%s3211_s1 + $0x170] ss:$8 sps:$4 sm:$0xff]   ;;  %v2307_v40 = vld [vmem:[%s3211_s1 + $0x164] ss:$8 sps:$4 sm:$0xff]  }
  0x1a   : > { %1212 = vmatpush1.bf16.msra.mxu0 %v2256_v7  ;;  %2206 = vmatpush1.bf16.msra.mxu1 %v2256_v7  ;;  %v2296_v37 = vld [vmem:[%s2574_s20 + $0x140] ss:$20 sps:$4 sm:$0xff]   ;;  %v2302_v39 = vld [vmem:[%s3211_s1 + $0x230] ss:$8 sps:$4 sm:$0xff]   ;;  %v2331_v43 = vld [vmem:[%s3211_s1 + $0x224] ss:$8 sps:$4 sm:$0xff]  }
  0x1b   : > { %1213 = vmatprep.subr.bf16.mxu0 %v2257_v8  ;;  %2191 = vmatprep.subr.bf16.mxu1 %v2257_v8  ;;  %v2308_v41 = vld [vmem:[%s2574_s20 + $0x2c] ss:$20 sps:$4 sm:$0xff]   ;;  %v2316_v45 = vld [vmem:[%s3211_s1 + $0x154] ss:$8 sps:$4 sm:$0xff]   ;;  %v2314_v50 = vld [vmem:[%s3211_s1 + $0x150] ss:$8 sps:$4 sm:$0xff]  }
  0x1c   : > { %v2310_v42 = vld [vmem:[%s2574_s20 + $0x16c] ss:$20 sps:$4 sm:$0xff]   ;;  %v2358_v47 = vld [vmem:[%s3211_s1 + $0x214] ss:$8 sps:$4 sm:$0xff]   ;;  %v2356_v54 = vld [vmem:[%s3211_s1 + $0x210] ss:$8 sps:$4 sm:$0xff]  }
  0x1d   : > { %v2305_v44 = vld [vmem:[%s3211_s1 + $0x160] ss:$8 sps:$4 sm:$0xff]   ;;  %v2319_v52 = vld [vmem:[%s3211_s1 + $0x144] ss:$8 sps:$4 sm:$0xff]   ;;  %v2328_v58 = vld [vmem:[%s3211_s1 + $0x134] ss:$8 sps:$4 sm:$0xff]  }
  0x1e   : > { %1214 = vmatpush1.bf16.msra.mxu0 %v2259_v9  ;;  %2207 = vmatpush1.bf16.msra.mxu1 %v2259_v9  ;;  %v2329_v46 = vld [vmem:[%s3211_s1 + $0x220] ss:$8 sps:$4 sm:$0xff]   ;;  %v2385_v55 = vld [vmem:[%s3211_s1 + $0x204] ss:$8 sps:$4 sm:$0xff]   ;;  %v2326_v61 = vld [vmem:[%s3211_s1 + $0x130] ss:$8 sps:$4 sm:$0xff]  }
  0x1f   : > { %1215 = vmatprep.subr.bf16.mxu0 %v2260_v10  ;;  %2192 = vmatprep.subr.bf16.mxu1 %v2260_v10  ;;  %v2312_v48 = vld [vmem:[%s2574_s20 + $0x28] ss:$20 sps:$4 sm:$0xff]   ;;  %v2324_v57 = vld [vmem:[%s2574_s20 + $0x50] ss:$20 sps:$4 sm:$0xff]   ;;  %v2339_v2 = vld [vmem:[%s2574_s20 + $0x78] ss:$20 sps:$4 sm:$0xff]  }
  0x20   : > { %v2313_v49 = vld [vmem:[%s2574_s20 + $0x168] ss:$20 sps:$4 sm:$0xff]   ;;  %v2325_v59 = vld [vmem:[%s2574_s20 + $0x190] ss:$20 sps:$4 sm:$0xff]   ;;  %v2340_v4 = vld [vmem:[%s2574_s20 + $0x1b8] ss:$20 sps:$4 sm:$0xff]  }
  0x21   : > { %v2320_v51 = vld [vmem:[%s2574_s20 + $0x54] ss:$20 sps:$4 sm:$0xff]   ;;  %v2334_v62 = vld [vmem:[%s3211_s1 + $0x124] ss:$8 sps:$4 sm:$0xff]   ;;  %v2335_v63 = vld [vmem:[%s2574_s20 + $0x7c] ss:$20 sps:$4 sm:$0xff]  }
  0x22   : > { %1216 = vmatpush1.bf16.msra.mxu0 %v2262_v11  ;;  %2208 = vmatpush1.bf16.msra.mxu1 %v2262_v11  ;;  %v2322_v53 = vld [vmem:[%s2574_s20 + $0x194] ss:$20 sps:$4 sm:$0xff]   ;;  %v2337_v0 = vld [vmem:[%s2574_s20 + $0x1bc] ss:$20 sps:$4 sm:$0xff]   ;;  %v2346_v6 = vld [vmem:[%s3211_s1 + $0x104] ss:$8 sps:$4 sm:$0xff]  }
  0x23   : > { %1217 = vmatprep.subr.bf16.mxu0 %v2263_v12  ;;  %2193 = vmatprep.subr.bf16.mxu1 %v2263_v12  ;;  %v2317_v56 = vld [vmem:[%s3211_s1 + $0x140] ss:$8 sps:$4 sm:$0xff]   ;;  %v2343_v3 = vld [vmem:[%s3211_s1 + $0x114] ss:$8 sps:$4 sm:$0xff]   ;;  %v2341_v5 = vld [vmem:[%s3211_s1 + $0x110] ss:$8 sps:$4 sm:$0xff]  }
  0x24   : > { %v2383_v60 = vld [vmem:[%s3211_s1 + $0x200] ss:$8 sps:$4 sm:$0xff]   ;;  %v2347_v7 = vld [vmem:[%s2574_s20 + $0xa4] ss:$20 sps:$4 sm:$0xff]   ;;  %v2355_v11 = vld [vmem:[%s3211_s1 + $0x1f4] ss:$8 sps:$4 sm:$0xff]  }
  0x25   : > { %v2332_v1 = vld [vmem:[%s3211_s1 + $0x120] ss:$8 sps:$4 sm:$0xff]   ;;  %v2349_v8 = vld [vmem:[%s2574_s20 + $0x1e4] ss:$20 sps:$4 sm:$0xff]  }
  0x26   : > { %1218 = vmatpush1.bf16.msra.mxu0 %v2265_v14  ;;  %2209 = vmatpush1.bf16.msra.mxu1 %v2265_v14  ;;  %v2344_v9 = vld [vmem:[%s3211_s1 + $0x100] ss:$8 sps:$4 sm:$0xff]   ;;  %v2353_v13 = vld [vmem:[%s3211_s1 + $0x1f0] ss:$8 sps:$4 sm:$0xff]   ;;  %v2361_v14 = vld [vmem:[%s3211_s1 + $0x1e4] ss:$8 sps:$4 sm:$0xff]  }
  0x27   : > { %1219 = vmatprep.subr.bf16.mxu0 %v2266_v16  ;;  %2194 = vmatprep.subr.bf16.mxu1 %v2266_v16  ;;  %v2351_v10 = vld [vmem:[%s2574_s20 + $0xa0] ss:$20 sps:$4 sm:$0xff]  }
  0x28   : > { %v2352_v12 = vld [vmem:[%s2574_s20 + $0x1e0] ss:$20 sps:$4 sm:$0xff]  }
  0x29   : > { %v2362_v15 = vld [vmem:[%s2574_s20 + $0xcc] ss:$20 sps:$4 sm:$0xff]  }
  0x2a   : > { %1220 = vmatpush1.bf16.msra.mxu0 %v2268_v17  ;;  %2210 = vmatpush1.bf16.msra.mxu1 %v2268_v17  ;;  %v2364_v16 = vld [vmem:[%s2574_s20 + $0x20c] ss:$20 sps:$4 sm:$0xff]  }
  0x2b   : > { %1221 = vmatprep.subr.bf16.mxu0 %v2269_v18  ;;  %2195 = vmatprep.subr.bf16.mxu1 %v2269_v18  ;;  %v2359_v17 = vld [vmem:[%s3211_s1 + $0x1e0] ss:$8 sps:$4 sm:$0xff]  }
  0x2c   : > { %v2366_v18 = vld [vmem:[%s2574_s20 + $0xc8] ss:$20 sps:$4 sm:$0xff]  }
  0x2e   : > { %1222 = vmatpush2.bf16.msra.mxu0 %v2271_v19  ;;  %2211 = vmatpush2.bf16.msra.mxu1 %v2271_v19  ;;  %v2367_v19 = vld [vmem:[%s2574_s20 + $0x208] ss:$20 sps:$4 sm:$0xff]  }
  0x2f   : > { %1223 = vmatprep.subr.bf16.mxu0 %v2272_v20  ;;  %2196 = vmatprep.subr.bf16.mxu1 %v2272_v20  ;;  %v2370_v20 = vld [vmem:[%s3211_s1 + $0x1d4] ss:$8 sps:$4 sm:$0xff]  }
  0x32   : > { %1224 = vmatpush2.bf16.msra.mxu0 %v2274_v21  ;;  %2212 = vmatpush2.bf16.msra.mxu1 %v2274_v21  ;;  %v2368_v21 = vld [vmem:[%s3211_s1 + $0x1d0] ss:$8 sps:$4 sm:$0xff]  }
  0x33   : > { %1225 = vmatprep.subr.bf16.mxu0 %v2275_v22  ;;  %2197 = vmatprep.subr.bf16.mxu1 %v2275_v22  ;;  %v2374_v22 = vld [vmem:[%s2574_s20 + $0xf4] ss:$20 sps:$4 sm:$0xff]  }
  0x36   : > { %1226 = vmatpush2.bf16.msra.mxu0 %v2277_v23  ;;  %2213 = vmatpush2.bf16.msra.mxu1 %v2277_v23  ;;  %v2373_v23 = vld [vmem:[%s3211_s1 + $0x1c4] ss:$8 sps:$4 sm:$0xff]  }
  0x37   : > { %1227 = vmatprep.subr.bf16.mxu0 %v2278_v24  ;;  %2198 = vmatprep.subr.bf16.mxu1 %v2278_v24  ;;  %v2376_v24 = vld [vmem:[%s2574_s20 + $0x234] ss:$20 sps:$4 sm:$0xff]  }
  0x3a   : > { %1228 = vmatpush2.bf16.msra.mxu0 %v2280_v25  ;;  %2214 = vmatpush2.bf16.msra.mxu1 %v2280_v25  ;;  %v2371_v25 = vld [vmem:[%s3211_s1 + $0x1c0] ss:$8 sps:$4 sm:$0xff]  }
  0x3b   : > { %1229 = vmatprep.subr.bf16.mxu0 %v2281_v26  ;;  %2199 = vmatprep.subr.bf16.mxu1 %v2281_v26  ;;  %v2382_v26 = vld [vmem:[%s3211_s1 + $0x1b4] ss:$8 sps:$4 sm:$0xff]  }
  0x3e   : > { %1230 = vmatpush2.bf16.msra.mxu0 %v2283_v27  ;;  %2215 = vmatpush2.bf16.msra.mxu1 %v2283_v27  ;;  %v2378_v27 = vld [vmem:[%s2574_s20 + $0xf0] ss:$20 sps:$4 sm:$0xff]  }
  0x3f   : > { %1231 = vmatprep.subr.bf16.mxu0 %v2284_v28  ;;  %2200 = vmatprep.subr.bf16.mxu1 %v2284_v28  ;;  %v2379_v28 = vld [vmem:[%s2574_s20 + $0x230] ss:$20 sps:$4 sm:$0xff]  }
  0x42   : > { %1232 = vmatpush2.bf16.msra.mxu0 %v2286_v29  ;;  %2216 = vmatpush2.bf16.msra.mxu1 %v2286_v29  ;;  %v2380_v29 = vld [vmem:[%s3211_s1 + $0x1b0] ss:$8 sps:$4 sm:$0xff]  }
  0x43   : > { %1233 = vmatprep.subr.bf16.mxu0 %v2287_v30  ;;  %2201 = vmatprep.subr.bf16.mxu1 %v2287_v30  ;;  %v2389_v30 = vld [vmem:[%s2574_s20 + $0x11c] ss:$20 sps:$4 sm:$0xff]  }
  0x46   : > { %1234 = vmatpush2.bf16.msra.mxu0 %v2289_v31  ;;  %2217 = vmatpush2.bf16.msra.mxu1 %v2289_v31  ;;  %v2388_v31 = vld [vmem:[%s3211_s1 + $0x1a4] ss:$8 sps:$4 sm:$0xff]  }
  0x47   : > { %1235 = vmatprep.subr.bf16.mxu0 %v2290_v32  ;;  %2202 = vmatprep.subr.bf16.mxu1 %v2290_v32  ;;  %v2391_v32 = vld [vmem:[%s2574_s20 + $0x25c] ss:$20 sps:$4 sm:$0xff]  }
  0x4a   : > { %1236 = vmatpush2.bf16.msra.mxu0 %v2292_v33  ;;  %2218 = vmatpush2.bf16.msra.mxu1 %v2292_v33  ;;  %v2386_v33 = vld [vmem:[%s3211_s1 + $0x1a0] ss:$8 sps:$4 sm:$0xff]  }
  0x4b   : > { %1398 = vmatprep.subr.bf16.mxu1 %v2301_v34  ;;  %1599 = vmatprep.subr.bf16.mxu0 %v2304_v36  ;;  %v2397_v34 = vld [vmem:[%s3211_s1 + $0x194] ss:$8 sps:$4 sm:$0xff]   ;;  %v2394_v36 = vld [vmem:[%s2574_s20 + $0x258] ss:$20 sps:$4 sm:$0xff]  }
  0x4d   : > { %1238 = vmatmul.mubr.bf16.vlgmr.msra.gmra.mxu0 %v2293_v35  ;;  %1318 = vmatmul.mubr.bf16.vlgmr.msra.gmra.mxu1 %v2296_v37  ;;  %v2393_v35 = vld [vmem:[%s2574_s20 + $0x118] ss:$20 sps:$4 sm:$0xff]  }
  0x4e   : > { %1399 = vmatpush1.bf16.msra.mxu1 %v2299_v38  ;;  %1600 = vmatpush1.bf16.msra.mxu0 %v2302_v39  ;;  %v2395_v37 = vld [vmem:[%s3211_s1 + $0x190] ss:$8 sps:$4 sm:$0xff]   ;;  %v2403_v38 = vld [vmem:[%s2574_s20 + $0xc] ss:$20 sps:$4 sm:$0xff]  }
  0x4f   : > { %1400 = vmatprep.subr.bf16.mxu1 %v2307_v40  ;;  %1247 = vmatprep.mubr.bf16.mxu0 %v2308_v41  ;;  %v2400_v39 = vld [vmem:[%s3211_s1 + $0x184] ss:$8 sps:$4 sm:$0xff]   ;;  %v2398_v40 = vld [vmem:[%s3211_s1 + $0x180] ss:$8 sps:$4 sm:$0xff]   ;;  %v2489_v41 = vmov 0  }
  0x50   : > { %1327 = vmatprep.mubr.bf16.mxu1 %v2310_v42  ;;  %1601 = vmatprep.subr.bf16.mxu0 %v2331_v43  ;;  %v2401_v42 = vld [vmem:[%s2574_s20 + $0x8] ss:$20 sps:$4 sm:$0xff]   ;;  %v2404_v43 = vld [vmem:[%s2574_s20 + $0x10] ss:$20 sps:$4 sm:$0xff]  }
  0x52   : > { %1401 = vmatpush1.bf16.msra.mxu1 %v2305_v44  ;;  %1602 = vmatpush1.bf16.msra.mxu0 %v2329_v46  ;;  %v2405_v44 = vld [vmem:[%s2574_s20 + $0x34] ss:$20 sps:$4 sm:$0xff]   ;;  %v2408_v46 = vld [vmem:[%s2574_s20 + $0x38] ss:$20 sps:$4 sm:$0xff]  }
  0x53   : > { %1402 = vmatprep.subr.bf16.mxu1 %v2316_v45  ;;  %1603 = vmatprep.subr.bf16.mxu0 %v2358_v47  ;;  %v2407_v45 = vld [vmem:[%s2574_s20 + $0x30] ss:$20 sps:$4 sm:$0xff]  }
  0x54   : > { %v2409_v47 = vld [vmem:[%s2574_s20 + $0x5c] ss:$20 sps:$4 sm:$0xff]  }
  0x55   : > { %1248 = vmatmul.mubr.bf16.gmra.mxu0 %v2312_v48  ;;  %1328 = vmatmul.mubr.bf16.gmra.mxu1 %v2313_v49  ;;  %v2411_v48 = vld [vmem:[%s2574_s20 + $0x58] ss:$20 sps:$4 sm:$0xff]   ;;  %v2412_v49 = vld [vmem:[%s2574_s20 + $0x60] ss:$20 sps:$4 sm:$0xff]  }
  0x56   : > { %1403 = vmatpush1.bf16.msra.mxu1 %v2314_v50  ;;  %1257 = vmatprep.mubr.bf16.mxu0 %v2320_v51  ;;  %v2413_v50 = vld [vmem:[%s2574_s20 + $0x84] ss:$20 sps:$4 sm:$0xff]   ;;  %v2415_v51 = vld [vmem:[%s2574_s20 + $0x80] ss:$20 sps:$4 sm:$0xff]  }
  0x57   : > { %1404 = vmatprep.subr.bf16.mxu1 %v2319_v52  ;;  %1337 = vmatprep.mubr.bf16.mxu1 %v2322_v53  ;;  %v2416_v52 = vld [vmem:[%s2574_s20 + $0x88] ss:$20 sps:$4 sm:$0xff]   ;;  %v2417_v53 = vld [vmem:[%s2574_s20 + $0xac] ss:$20 sps:$4 sm:$0xff]  }
  0x58   : > { %1604 = vmatpush1.bf16.msra.mxu0 %v2356_v54  ;;  %v2419_v54 = vld [vmem:[%s2574_s20 + $0xa8] ss:$20 sps:$4 sm:$0xff]  }
  0x59   : > { %1605 = vmatprep.subr.bf16.mxu0 %v2385_v55  ;;  %v2420_v55 = vld [vmem:[%s2574_s20 + $0xb0] ss:$20 sps:$4 sm:$0xff]  }
  0x5a   : > { %1405 = vmatpush1.bf16.msra.mxu1 %v2317_v56  ;;  %v2421_v56 = vld [vmem:[%s2574_s20 + $0xd4] ss:$20 sps:$4 sm:$0xff]  }
  0x5b   : > { %1406 = vmatprep.subr.bf16.mxu1 %v2328_v58  ;;  %v2424_v58 = vld [vmem:[%s2574_s20 + $0xd8] ss:$20 sps:$4 sm:$0xff]  }
  0x5c   : > { %1606 = vmatpush1.bf16.msra.mxu0 %v2383_v60  ;;  %v2427_v60 = vld [vmem:[%s2574_s20 + $0xf8] ss:$20 sps:$4 sm:$0xff]  }
  0x5d   : > { %1258 = vmatmul.mubr.bf16.gmra.mxu0 %v2324_v57  ;;  %1338 = vmatmul.mubr.bf16.gmra.mxu1 %v2325_v59  ;;  %v2423_v57 = vld [vmem:[%s2574_s20 + $0xd0] ss:$20 sps:$4 sm:$0xff]  }
  0x5e   : > { %1407 = vmatpush1.bf16.msra.mxu1 %v2326_v61  ;;  %1267 = vmatprep.mubr.bf16.mxu0 %v2335_v63  ;;  %v2425_v59 = vld [vmem:[%s2574_s20 + $0xfc] ss:$20 sps:$4 sm:$0xff]   ;;  %v2428_v61 = vld [vmem:[%s2574_s20 + $0x100] ss:$20 sps:$4 sm:$0xff]  }
  0x5f   : > { %1408 = vmatprep.subr.bf16.mxu1 %v2334_v62  ;;  %1347 = vmatprep.mubr.bf16.mxu1 %v2337_v0  ;;  %v2429_v62 = vld [vmem:[%s2574_s20 + $0x124] ss:$20 sps:$4 sm:$0xff]   ;;  %v2431_v63 = vld [vmem:[%s2574_s20 + $0x120] ss:$20 sps:$4 sm:$0xff]   ;;  %v2432_v0 = vld [vmem:[%s2574_s20 + $0x128] ss:$20 sps:$4 sm:$0xff]  }
  0x62   : > { %1409 = vmatpush1.bf16.msra.mxu1 %v2332_v1  ;;  %v2433_v1 = vld [vmem:[%s2574_s20 + $0x14c] ss:$20 sps:$4 sm:$0xff]  }
  0x63   : > { %1410 = vmatprep.subr.bf16.mxu1 %v2343_v3  ;;  %v2436_v3 = vld [vmem:[%s2574_s20 + $0x150] ss:$20 sps:$4 sm:$0xff]  }
  0x65   : > { %1268 = vmatmul.mubr.bf16.gmra.mxu0 %v2339_v2  ;;  %1348 = vmatmul.mubr.bf16.gmra.mxu1 %v2340_v4  ;;  %v2435_v2 = vld [vmem:[%s2574_s20 + $0x148] ss:$20 sps:$4 sm:$0xff]  }
  0x66   : > { %1411 = vmatpush1.bf16.msra.mxu1 %v2341_v5  ;;  %1277 = vmatprep.mubr.bf16.mxu0 %v2347_v7  ;;  %v2437_v4 = vld [vmem:[%s2574_s20 + $0x174] ss:$20 sps:$4 sm:$0xff]   ;;  %v2439_v5 = vld [vmem:[%s2574_s20 + $0x170] ss:$20 sps:$4 sm:$0xff]  }
  0x67   : > { %1412 = vmatprep.subr.bf16.mxu1 %v2346_v6  ;;  %1357 = vmatprep.mubr.bf16.mxu1 %v2349_v8  ;;  %v2440_v6 = vld [vmem:[%s2574_s20 + $0x178] ss:$20 sps:$4 sm:$0xff]   ;;  %v2441_v7 = vld [vmem:[%s2574_s20 + $0x19c] ss:$20 sps:$4 sm:$0xff]  }
  0x68   : > { %v2443_v8 = vld [vmem:[%s2574_s20 + $0x198] ss:$20 sps:$4 sm:$0xff]  }
  0x6a   : > { %1413 = vmatpush1.bf16.msra.mxu1 %v2344_v9  ;;  %v2444_v9 = vld [vmem:[%s2574_s20 + $0x1a0] ss:$20 sps:$4 sm:$0xff]  }
  0x6b   : > { %1414 = vmatprep.subr.bf16.mxu1 %v2355_v11  ;;  %v2447_v11 = vld [vmem:[%s2574_s20 + $0x1c0] ss:$20 sps:$4 sm:$0xff]  }
  0x6d   : > { %1278 = vmatmul.mubr.bf16.gmra.mxu0 %v2351_v10  ;;  %1358 = vmatmul.mubr.bf16.gmra.mxu1 %v2352_v12  ;;  %v2445_v10 = vld [vmem:[%s2574_s20 + $0x1c4] ss:$20 sps:$4 sm:$0xff]   ;;  %v2448_v12 = vld [vmem:[%s2574_s20 + $0x1c8] ss:$20 sps:$4 sm:$0xff]  }
  0x6e   : > { %1415 = vmatpush2.bf16.msra.mxu1 %v2353_v13  ;;  %1287 = vmatprep.mubr.bf16.mxu0 %v2362_v15  ;;  %v2449_v13 = vld [vmem:[%s2574_s20 + $0x1ec] ss:$20 sps:$4 sm:$0xff]   ;;  %v2452_v15 = vld [vmem:[%s2574_s20 + $0x1f0] ss:$20 sps:$4 sm:$0xff]  }
  0x6f   : > { %1416 = vmatprep.subr.bf16.mxu1 %v2361_v14  ;;  %1367 = vmatprep.mubr.bf16.mxu1 %v2364_v16  ;;  %v2451_v14 = vld [vmem:[%s2574_s20 + $0x1e8] ss:$20 sps:$4 sm:$0xff]  }
  0x70   : > { %v2453_v16 = vld [vmem:[%s2574_s20 + $0x214] ss:$20 sps:$4 sm:$0xff]  }
  0x72   : > { %1417 = vmatpush2.bf16.msra.mxu1 %v2359_v17  ;;  %v2455_v17 = vld [vmem:[%s2574_s20 + $0x210] ss:$20 sps:$4 sm:$0xff]  }
  0x73   : > { %1418 = vmatprep.subr.bf16.mxu1 %v2370_v20  ;;  %v2459_v20 = vld [vmem:[%s2574_s20 + $0x238] ss:$20 sps:$4 sm:$0xff]  }
  0x75   : > { %1288 = vmatmul.mubr.bf16.gmra.mxu0 %v2366_v18  ;;  %1368 = vmatmul.mubr.bf16.gmra.mxu1 %v2367_v19  ;;  %v2456_v18 = vld [vmem:[%s2574_s20 + $0x218] ss:$20 sps:$4 sm:$0xff]   ;;  %v2457_v19 = vld [vmem:[%s2574_s20 + $0x23c] ss:$20 sps:$4 sm:$0xff]  }
  0x76   : > { %1419 = vmatpush2.bf16.msra.mxu1 %v2368_v21  ;;  %1297 = vmatprep.mubr.bf16.mxu0 %v2374_v22  ;;  %v2460_v21 = vld [vmem:[%s2574_s20 + $0x240] ss:$20 sps:$4 sm:$0xff]   ;;  %v2461_v22 = vld [vmem:[%s2574_s20 + $0x264] ss:$20 sps:$4 sm:$0xff]  }
  0x77   : > { %1420 = vmatprep.subr.bf16.mxu1 %v2373_v23  ;;  %1377 = vmatprep.mubr.bf16.mxu1 %v2376_v24  ;;  %v386_v23 = vlaneseq  ;;  %v2463_v24 = vld [vmem:[%s2574_s20 + $0x260] ss:$20 sps:$4 sm:$0xff]  }
  0x7a   : > { %1421 = vmatpush2.bf16.msra.mxu1 %v2371_v25  ;;  %v2464_v25 = vld [vmem:[%s2574_s20 + $0x268] ss:$20 sps:$4 sm:$0xff]   ;;  %s2186_s20 = sshll.u32 %s3255_s12, 9 }
  0x7b   : > { %1422 = vmatprep.subr.bf16.mxu1 %v2382_v26  ;;  %v387_v26 = vshrl.u32 %v386_v23, 7  ;;  %s3045_s8 = scalar_lea.vmem %s3213_s3, %s2186_s20 }
  0x7d   : > { %1298 = vmatmul.mubr.bf16.gmra.mxu0 %v2378_v27  ;;  %1378 = vmatmul.mubr.bf16.gmra.mxu1 %v2379_v28  ;;  %v388_v27 = vsub.s32 0, %v387_v26  ;;  %v384_v28 = vld [vmem:[%s3212_s2] sm:$0x3] }
  0x7e   : > { %1423 = vmatpush2.bf16.msra.mxu1 %v2380_v29  ;;  %1307 = vmatprep.mubr.bf16.mxu0 %v2389_v30  ;;  %v392_v29 = vsub.s32 1, %v387_v26 }
  0x7f   : > { %1424 = vmatprep.subr.bf16.mxu1 %v2388_v31  ;;  %1387 = vmatprep.mubr.bf16.mxu1 %v2391_v32  ;;  %v2871_v30 = vrot.slane %v384_v28, %v388_v27 }
  0x80   : > { %v2873_v31 = vrot.slane %v384_v28, %v392_v29 }
  0x82   : > { %1425 = vmatpush2.bf16.msra.mxu1 %v2386_v33 }
  0x83   : > { %1426 = vmatprep.subr.bf16.mxu1 %v2397_v34 }
  0x85   : > { %1308 = vmatmul.mubr.bf16.gmra.mxu0 %v2393_v35  ;;  %1388 = vmatmul.mubr.bf16.gmra.mxu1 %v2394_v36 }
  0x86   : > { %1427 = vmatpush2.bf16.msra.mxu1 %v2395_v37  ;;  %1430 = vmatprep.mubr.bf16.mxu1 %v2403_v38 }
  0x87   : > { %1428 = vmatprep.subr.bf16.mxu1 %v2400_v39  ;;  %1623 = vmatprep.mubr.bf16.mxu0 %v2489_v41 }
  0x8a   : > { %1429 = vmatpush2.bf16.msra.mxu1 %v2398_v40 }
  0x8d   : > { %1431 = vmatmul.mubr.bf16.vlgmr.msra.gmra.mxu1 %v2401_v42  ;;  %2168 = vmatmul.mubr.msk.bf16.vlgmr.msra.gmra.mxu0 %vm1156_vm0, %v2404_v43 }
  0x8e   : > { %1440 = vmatprep.mubr.bf16.mxu1 %v2405_v44  ;;  %1633 = vmatprep.mubr.bf16.mxu0 %v2489_v41 }
  0x95   : > { %1441 = vmatmul.mubr.bf16.gmra.mxu1 %v2407_v45  ;;  %2169 = vmatmul.mubr.msk.bf16.gmra.mxu0 %vm1156_vm0, %v2408_v46 }
  0x96   : > { %1450 = vmatprep.mubr.bf16.mxu1 %v2409_v47  ;;  %1643 = vmatprep.mubr.bf16.mxu0 %v2489_v41 }
  0x9d   : > { %1451 = vmatmul.mubr.bf16.gmra.mxu1 %v2411_v48  ;;  %2170 = vmatmul.mubr.msk.bf16.gmra.mxu0 %vm1156_vm0, %v2412_v49 }
  0x9e   : > { %1460 = vmatprep.mubr.bf16.mxu1 %v2413_v50  ;;  %1653 = vmatprep.mubr.bf16.mxu0 %v2489_v41 }
  0xa5   : > { %1461 = vmatmul.mubr.bf16.gmra.mxu1 %v2415_v51  ;;  %2171 = vmatmul.mubr.msk.bf16.gmra.mxu0 %vm1156_vm0, %v2416_v52 }
  0xa6   : > { %1470 = vmatprep.mubr.bf16.mxu1 %v2417_v53  ;;  %1663 = vmatprep.mubr.bf16.mxu0 %v2489_v41 }
  0xad   : > { %1471 = vmatmul.mubr.bf16.gmra.mxu1 %v2419_v54  ;;  %2172 = vmatmul.mubr.msk.bf16.gmra.mxu0 %vm1156_vm0, %v2420_v55 }
  0xae   : > { %1480 = vmatprep.mubr.bf16.mxu1 %v2421_v56  ;;  %1673 = vmatprep.mubr.bf16.mxu0 %v2489_v41 }
  0xb5   : > { %1481 = vmatmul.mubr.bf16.gmra.mxu1 %v2423_v57  ;;  %2173 = vmatmul.mubr.msk.bf16.gmra.mxu0 %vm1156_vm0, %v2424_v58 }
  0xb6   : > { %1490 = vmatprep.mubr.bf16.mxu1 %v2425_v59  ;;  %1683 = vmatprep.mubr.bf16.mxu0 %v2489_v41 }
  0xbd   : > { %1491 = vmatmul.mubr.bf16.gmra.mxu1 %v2427_v60  ;;  %2174 = vmatmul.mubr.msk.bf16.gmra.mxu0 %vm1156_vm0, %v2428_v61 }
  0xbe   : > { %1500 = vmatprep.mubr.bf16.mxu1 %v2429_v62  ;;  %1693 = vmatprep.mubr.bf16.mxu0 %v2489_v41 }
  0xc5   : > { %1501 = vmatmul.mubr.bf16.gmra.mxu1 %v2431_v63  ;;  %2175 = vmatmul.mubr.msk.bf16.gmra.mxu0 %vm1156_vm0, %v2432_v0 }
  0xc6   : > { %1510 = vmatprep.mubr.bf16.mxu1 %v2433_v1  ;;  %1703 = vmatprep.mubr.bf16.mxu0 %v2489_v41 }
  0xcd   : > { %1511 = vmatmul.mubr.bf16.gmra.mxu1 %v2435_v2  ;;  %2176 = vmatmul.mubr.msk.bf16.gmra.mxu0 %vm1156_vm0, %v2436_v3 }
  0xce   : > { %1520 = vmatprep.mubr.bf16.mxu1 %v2437_v4  ;;  %1713 = vmatprep.mubr.bf16.mxu0 %v2489_v41 }
  0xd5   : > { %1521 = vmatmul.mubr.bf16.gmra.mxu1 %v2439_v5  ;;  %2177 = vmatmul.mubr.msk.bf16.gmra.mxu0 %vm1156_vm0, %v2440_v6 }
  0xd6   : > { %1530 = vmatprep.mubr.bf16.mxu1 %v2441_v7  ;;  %1723 = vmatprep.mubr.bf16.mxu0 %v2489_v41 }
  0xdd   : > { %1531 = vmatmul.mubr.bf16.gmra.mxu1 %v2443_v8  ;;  %2178 = vmatmul.mubr.msk.bf16.gmra.mxu0 %vm1156_vm0, %v2444_v9 }
  0xde   : > { %1540 = vmatprep.mubr.bf16.mxu1 %v2445_v10  ;;  %1733 = vmatprep.mubr.bf16.mxu0 %v2489_v41 }
  0xe5   : > { %1541 = vmatmul.mubr.bf16.gmra.mxu1 %v2447_v11  ;;  %2179 = vmatmul.mubr.msk.bf16.gmra.mxu0 %vm1156_vm0, %v2448_v12 }
  0xe6   : > { %1550 = vmatprep.mubr.bf16.mxu1 %v2449_v13  ;;  %1743 = vmatprep.mubr.bf16.mxu0 %v2489_v41 }
  0xed   : > { %1551 = vmatmul.mubr.bf16.gmra.mxu1 %v2451_v14  ;;  %2180 = vmatmul.mubr.msk.bf16.gmra.mxu0 %vm1156_vm0, %v2452_v15 }
  0xee   : > { %1560 = vmatprep.mubr.bf16.mxu1 %v2453_v16  ;;  %1753 = vmatprep.mubr.bf16.mxu0 %v2489_v41 }
  0xf5   : > { %1561 = vmatmul.mubr.bf16.gmra.mxu1 %v2455_v17  ;;  %2181 = vmatmul.mubr.msk.bf16.gmra.mxu0 %vm1156_vm0, %v2456_v18 }
  0xf6   : > { %1570 = vmatprep.mubr.bf16.mxu1 %v2457_v19  ;;  %1763 = vmatprep.mubr.bf16.mxu0 %v2489_v41 }
  0xfd   : > { %1571 = vmatmul.mubr.bf16.gmra.mxu1 %v2459_v20  ;;  %2182 = vmatmul.mubr.msk.bf16.gmra.mxu0 %vm1156_vm0, %v2460_v21 }
  0xfe   : > { %1580 = vmatprep.mubr.bf16.mxu1 %v2461_v22  ;;  %1773 = vmatprep.mubr.bf16.mxu0 %v2489_v41 }
 0x105   : > { %1581 = vmatmul.mubr.bf16.gmra.mxu1 %v2463_v24  ;;  %2183 = vmatmul.mubr.msk.bf16.gmra.mxu0 %vm1156_vm0, %v2464_v25 }
 0x10d   : > { %v2875_v32 = vpop.f32.mrf.mxu0  ;;  %v1319_v33 = vpop.f32.mrf.mxu1 }
 0x10e   : > { %v2878_v34 = vadd.f32 %v1319_v33, %v2871_v30 }
 0x10f   : > { %v2880_v35 = vpop.f32.mrf.mxu0  ;;  %v1321_v36 = vpop.f32.mrf.mxu1 }
 0x110   : > { %v2883_v37 = vadd.f32 %v1321_v36, %v2873_v31 }
 0x111   : > { %v2885_v38 = vpop.f32.mrf.mxu0  ;;  %v1323_v39 = vpop.f32.mrf.mxu1 }
 0x112   : > { %v2888_v40 = vadd.f32 %v1323_v39, %v2871_v30 }
 0x113   : > { %v2890_v41 = vpop.f32.mrf.mxu0  ;;  %v1325_v42 = vpop.f32.mrf.mxu1 }
 0x114   : > { %v2893_v43 = vadd.f32 %v1325_v42, %v2873_v31 }
 0x115   : > { %v2895_v44 = vpop.f32.mrf.mxu0  ;;  %v1329_v45 = vpop.f32.mrf.mxu1 }
 0x116   : > { %v2898_v46 = vadd.f32 %v1329_v45, %v2871_v30 }
 0x117   : > { %v2900_v47 = vpop.f32.mrf.mxu0  ;;  %v1331_v48 = vpop.f32.mrf.mxu1 }
 0x118   : > { %v2903_v49 = vadd.f32 %v1331_v48, %v2873_v31 }
 0x119   : > { %v2905_v50 = vpop.f32.mrf.mxu0  ;;  %v1333_v51 = vpop.f32.mrf.mxu1 }
 0x11a   : > { %v2908_v52 = vadd.f32 %v1333_v51, %v2871_v30 }
 0x11b   : > { %v2910_v53 = vpop.f32.mrf.mxu0  ;;  %v1335_v54 = vpop.f32.mrf.mxu1 }
 0x11c   : > { %v2913_v55 = vadd.f32 %v1335_v54, %v2873_v31 }
 0x11d   : > { %v2915_v56 = vpop.f32.mrf.mxu0  ;;  %v1339_v57 = vpop.f32.mrf.mxu1 }
 0x11e   : > { %v2918_v58 = vadd.f32 %v1339_v57, %v2871_v30 }
 0x11f   : > { %v2920_v59 = vpop.f32.mrf.mxu0  ;;  %v1341_v60 = vpop.f32.mrf.mxu1 }
 0x120   : > { %v2923_v61 = vadd.f32 %v1341_v60, %v2873_v31 }
 0x121   : > { %v2925_v62 = vpop.f32.mrf.mxu0  ;;  %v1343_v63 = vpop.f32.mrf.mxu1 }
 0x122   : > { %v2928_v0 = vadd.f32 %v1343_v63, %v2871_v30 }
 0x123   : > { %v2930_v1 = vpop.f32.mrf.mxu0  ;;  %v1345_v2 = vpop.f32.mrf.mxu1 }
 0x124   : > { %v2933_v3 = vadd.f32 %v1345_v2, %v2873_v31 }
 0x125   : > { %v2935_v4 = vpop.f32.mrf.mxu0  ;;  %v1349_v5 = vpop.f32.mrf.mxu1 }
 0x126   : > { %v2938_v6 = vadd.f32 %v1349_v5, %v2871_v30 }
 0x127   : > { %v2940_v7 = vpop.f32.mrf.mxu0  ;;  %v1351_v8 = vpop.f32.mrf.mxu1 }
 0x128   : > { %v2943_v9 = vadd.f32 %v1351_v8, %v2873_v31 }
 0x129   : > { %v2945_v10 = vpop.f32.mrf.mxu0  ;;  %v1353_v11 = vpop.f32.mrf.mxu1 }
 0x12a   : > { %v2948_v12 = vadd.f32 %v1353_v11, %v2871_v30 }
 0x12b   : > { %v2950_v13 = vpop.f32.mrf.mxu0  ;;  %v1355_v14 = vpop.f32.mrf.mxu1 }
 0x12c   : > { %3214 = vst [vmem:[#allocation2_spill] sm:$0xff] %v2948_v12  ;;  %v2953_v15 = vadd.f32 %v1355_v14, %v2873_v31  ;;  %v1252_v12 = vadd.f32 %v2900_v47, %v2873_v31  ;;  %v1256_v47 = vadd.f32 %v2910_v53, %v2873_v31  ;;  %v1262_v53 = vadd.f32 %v2920_v59, %v2873_v31 }
 0x12d   : > { %v2955_v16 = vpop.f32.mrf.mxu0  ;;  %v1359_v17 = vpop.f32.mrf.mxu1  ;;  %v1266_v59 = vadd.f32 %v2930_v1, %v2873_v31  ;;  %v1272_v1 = vadd.f32 %v2940_v7, %v2873_v31  ;;  %v1276_v7 = vadd.f32 %v2950_v13, %v2873_v31 }
 0x12e   : > { %3215 = vst [vmem:[#allocation3_spill] sm:$0xff] %v2953_v15  ;;  %v2958_v18 = vadd.f32 %v1359_v17, %v2871_v30 }
 0x12f   : > { %v2960_v19 = vpop.f32.mrf.mxu0  ;;  %v1361_v20 = vpop.f32.mrf.mxu1 }
 0x130   : > { %3216 = vst [vmem:[#allocation4_spill] sm:$0xff] %v2958_v18  ;;  %v2963_v21 = vadd.f32 %v1361_v20, %v2873_v31  ;;  %v1282_v13 = vadd.f32 %v2960_v19, %v2873_v31 }
 0x131   : > { %v2965_v22 = vpop.f32.mrf.mxu0  ;;  %v1363_v23 = vpop.f32.mrf.mxu1 }
 0x132   : > { %3217 = vst [vmem:[#allocation5_spill] sm:$0xff] %v2963_v21  ;;  %v2968_v24 = vadd.f32 %v1363_v23, %v2871_v30 }
 0x133   : > { %v2970_v25 = vpop.f32.mrf.mxu0  ;;  %v1365_v26 = vpop.f32.mrf.mxu1 }
 0x134   : > { %3218 = vst [vmem:[#allocation6_spill] sm:$0xff] %v2968_v24  ;;  %v2973_v27 = vadd.f32 %v1365_v26, %v2873_v31  ;;  %v1286_v19 = vadd.f32 %v2970_v25, %v2873_v31 }
 0x135   : > { %v2975_v28 = vpop.f32.mrf.mxu0  ;;  %v1369_v29 = vpop.f32.mrf.mxu1 }
 0x136   : > { %3219 = vst [vmem:[#allocation7_spill] sm:$0xff] %v2973_v27  ;;  %v2978_v33 = vadd.f32 %v1369_v29, %v2871_v30 }
 0x137   : > { %v2980_v36 = vpop.f32.mrf.mxu0  ;;  %v1371_v39 = vpop.f32.mrf.mxu1 }
 0x138   : > { %3220 = vst [vmem:[#allocation8_spill] sm:$0xff] %v2978_v33  ;;  %v2983_v42 = vadd.f32 %v1371_v39, %v2873_v31  ;;  %v1292_v25 = vadd.f32 %v2980_v36, %v2873_v31 }
 0x139   : > { %v2985_v45 = vpop.f32.mrf.mxu0  ;;  %v1373_v48 = vpop.f32.mrf.mxu1 }
 0x13a   : > { %3221 = vst [vmem:[#allocation9_spill] sm:$0xff] %v2983_v42  ;;  %v2988_v51 = vadd.f32 %v1373_v48, %v2871_v30 }
 0x13b   : > { %v2990_v54 = vpop.f32.mrf.mxu0  ;;  %v1375_v57 = vpop.f32.mrf.mxu1 }
 0x13c   : > { %3222 = vst [vmem:[#allocation10_spill] sm:$0xff] %v2988_v51  ;;  %v2993_v60 = vadd.f32 %v1375_v57, %v2873_v31  ;;  %v1240_v51 = vadd.f32 %v2875_v32, %v2871_v30  ;;  %v1296_v36 = vadd.f32 %v2990_v54, %v2873_v31 }
 0x13d   : > { %v2995_v63 = vpop.f32.mrf.mxu0  ;;  %v1379_v2 = vpop.f32.mrf.mxu1 }
 0x13e   : > { %3223 = vst [vmem:[#allocation11_spill] sm:$0xff] %v2993_v60  ;;  %v2998_v5 = vadd.f32 %v1379_v2, %v2871_v30 }
 0x13f   : > { %v3000_v8 = vpop.f32.mrf.mxu0  ;;  %v1381_v11 = vpop.f32.mrf.mxu1 }
 0x140   : > { %3224 = vst [vmem:[#allocation12_spill] sm:$0xff] %v2998_v5  ;;  %v3003_v14 = vadd.f32 %v1381_v11, %v2873_v31  ;;  %v1302_v54 = vadd.f32 %v3000_v8, %v2873_v31 }
 0x141   : > { %v3005_v17 = vpop.f32.mrf.mxu0  ;;  %v1383_v20 = vpop.f32.mrf.mxu1 }
 0x142   : > { %3225 = vst [vmem:[#allocation13_spill] sm:$0xff] %v3003_v14  ;;  %v3008_v23 = vadd.f32 %v1383_v20, %v2871_v30 }
 0x143   : > { %v3010_v26 = vpop.f32.mrf.mxu0  ;;  %v1385_v29 = vpop.f32.mrf.mxu1 }
 0x144   : > { %3226 = vst [vmem:[#allocation14_spill] sm:$0xff] %v3008_v23  ;;  %v3013_v39 = vadd.f32 %v1385_v29, %v2873_v31  ;;  %v1306_v8 = vadd.f32 %v3010_v26, %v2873_v31 }
 0x145   : > { %v3015_v48 = vpop.f32.mrf.mxu0  ;;  %v1389_v57 = vpop.f32.mrf.mxu1 }
 0x146   : > { %3227 = vst [vmem:[#allocation15_spill] sm:$0xff] %v3013_v39  ;;  %v3018_v2 = vadd.f32 %v1389_v57, %v2871_v30 }
 0x147   : > { %v3020_v11 = vpop.f32.mrf.mxu0  ;;  %v1391_v14 = vpop.f32.mrf.mxu1 }
 0x148   : > { %3228 = vst [vmem:[#allocation16_spill] sm:$0xff] %v3018_v2  ;;  %v3023_v5 = vadd.f32 %v1391_v14, %v2873_v31  ;;  %v1242_v14 = vadd.f32 %v2880_v35, %v2873_v31  ;;  %v1246_v35 = vadd.f32 %v2890_v41, %v2873_v31  ;;  %v1312_v26 = vadd.f32 %v3020_v11, %v2873_v31 }
 0x149   : > { %v3025_v20 = vpop.f32.mrf.mxu0  ;;  %v1393_v23 = vpop.f32.mrf.mxu1 }
 0x14a   : > { %3229 = vst [vmem:[#allocation17_spill] sm:$0xff] %v3023_v5  ;;  %v3028_v60 = vadd.f32 %v1393_v23, %v2871_v30  ;;  %v1244_v23 = vadd.f32 %v2885_v38, %v2871_v30  ;;  %v1250_v38 = vadd.f32 %v2895_v44, %v2871_v30  ;;  %v1254_v44 = vadd.f32 %v2905_v50, %v2871_v30 }
 0x14b   : > { %v3030_v29 = vpop.f32.mrf.mxu0  ;;  %v1395_v39 = vpop.f32.mrf.mxu1  ;;  %v1260_v50 = vadd.f32 %v2915_v56, %v2871_v30  ;;  %v1264_v56 = vadd.f32 %v2925_v62, %v2871_v30  ;;  %v1270_v62 = vadd.f32 %v2935_v4, %v2871_v30  ;;  %v1274_v4 = vadd.f32 %v2945_v10, %v2871_v30 }
 0x14c   : > { %3230 = vst [vmem:[#allocation18_spill] sm:$0xff] %v3028_v60  ;;  %v3035_v57 = vadd.f32 %v1395_v39, %v2873_v31  ;;  %v1280_v10 = vadd.f32 %v2955_v16, %v2871_v30  ;;  %v1284_v16 = vadd.f32 %v2965_v22, %v2871_v30  ;;  %v1290_v22 = vadd.f32 %v2975_v28, %v2871_v30 }
 0x14d   : > { %v1432_v2 = vpop.f32.mrf.mxu1  ;;  %v1625_v42 = vpop.f32.mrf.mxu0  ;;  %v1294_v28 = vadd.f32 %v2985_v45, %v2871_v30  ;;  %v1300_v45 = vadd.f32 %v2995_v63, %v2871_v30  ;;  %v1304_v63 = vadd.f32 %v3005_v17, %v2871_v30  ;;  %v1310_v17 = vadd.f32 %v3015_v48, %v2871_v30 }
 0x14e   : > { %3231 = vst [vmem:[#allocation19_spill] sm:$0xff] %v3035_v57  ;;  %v1433_v5 = vadd.f32 %v1432_v2, %v1240_v51  ;;  %v1314_v48 = vadd.f32 %v3025_v20, %v2871_v30  ;;  %v1316_v11 = vadd.f32 %v3030_v29, %v2873_v31 }
 0x14f   : > { %v1434_v33 = vpop.f32.mrf.mxu1  ;;  %v1627_v27 = vpop.f32.mrf.mxu0 }
 0x150   : > { %v1626_v60 = vadd.f32 %v1625_v42, %v1433_v5  ;;  %v1435_v24 = vadd.f32 %v1434_v33, %v1242_v14 }
 0x151   : > { %v1436_v32 = vpop.f32.mrf.mxu1  ;;  %v1629_v39 = vpop.f32.mrf.mxu0 }
 0x152   : > { %v1784_v51 = vmax.f32 %v1626_v60, 0.0  ;;  %v1628_v2 = vadd.f32 %v1627_v27, %v1435_v24  ;;  %v1437_v57 = vadd.f32 %v1436_v32, %v1244_v23 }
 0x153   : > { %v1438_v21 = vpop.f32.mrf.mxu1  ;;  %v1631_v18 = vpop.f32.mrf.mxu0 }
 0x154   : > { %1848 = vst [vmem:[%s3045_s8] sm:$0xff] %v1784_v51  ;;  %v1785_v33 = vmax.f32 %v1628_v2, 0.0  ;;  %v1630_v42 = vadd.f32 %v1629_v39, %v1437_v57  ;;  %v1439_v5 = vadd.f32 %v1438_v21, %v1246_v35 }
 0x155   : > { %v1442_v14 = vpop.f32.mrf.mxu1  ;;  %v1635_v15 = vpop.f32.mrf.mxu0 }
 0x156   : > { %1849 = vst [vmem:[%s3045_s8 + $0x8] sm:$0xff] %v1785_v33  ;;  %v1786_v41 = vmax.f32 %v1630_v42, 0.0  ;;  %v1632_v24 = vadd.f32 %v1631_v18, %v1439_v5  ;;  %v1443_v27 = vadd.f32 %v1442_v14, %v1250_v38 }
 0x157   : > { %v1444_v60 = vpop.f32.mrf.mxu1  ;;  %v1637_v23 = vpop.f32.mrf.mxu0 }
 0x158   : > { %1850 = vst [vmem:[%s3045_s8 + $0x10] sm:$0xff] %v1786_v41  ;;  %v1787_v32 = vmax.f32 %v1632_v24, 0.0  ;;  %v1636_v57 = vadd.f32 %v1635_v15, %v1443_v27  ;;  %v1445_v21 = vadd.f32 %v1444_v60, %v1252_v12 }
 0x159   : > { %v1446_v39 = vpop.f32.mrf.mxu1  ;;  %v1639_v35 = vpop.f32.mrf.mxu0 }
 0x15a   : > { %1851 = vst [vmem:[%s3045_s8 + $0x18] sm:$0xff] %v1787_v32  ;;  %v1788_v51 = vmax.f32 %v1636_v57, 0.0  ;;  %v1638_v18 = vadd.f32 %v1637_v23, %v1445_v21  ;;  %v1447_v2 = vadd.f32 %v1446_v39, %v1254_v44 }
 0x15b   : > { %v1448_v38 = vpop.f32.mrf.mxu1  ;;  %v1641_v33 = vpop.f32.mrf.mxu0 }
 0x15c   : > { %1852 = vst [vmem:[%s3045_s8 + $0x20] sm:$0xff] %v1788_v51  ;;  %v1789_v42 = vmax.f32 %v1638_v18, 0.0  ;;  %v1640_v15 = vadd.f32 %v1639_v35, %v1447_v2  ;;  %v1449_v12 = vadd.f32 %v1448_v38, %v1256_v47 }
 0x15d   : > { %v1452_v5 = vpop.f32.mrf.mxu1  ;;  %v1645_v14 = vpop.f32.mrf.mxu0 }
 0x15e   : > { %1853 = vst [vmem:[%s3045_s8 + $0x28] sm:$0xff] %v1789_v42  ;;  %v1790_v41 = vmax.f32 %v1640_v15, 0.0  ;;  %v1642_v24 = vadd.f32 %v1641_v33, %v1449_v12  ;;  %v1453_v27 = vadd.f32 %v1452_v5, %v1260_v50 }
 0x15f   : > { %v1454_v60 = vpop.f32.mrf.mxu1  ;;  %v1647_v23 = vpop.f32.mrf.mxu0 }
 0x160   : > { %1854 = vst [vmem:[%s3045_s8 + $0x30] sm:$0xff] %v1790_v41  ;;  %v1791_v44 = vmax.f32 %v1642_v24, 0.0  ;;  %v1646_v32 = vadd.f32 %v1645_v14, %v1453_v27  ;;  %v1455_v57 = vadd.f32 %v1454_v60, %v1262_v53 }
 0x161   : > { %v1456_v21 = vpop.f32.mrf.mxu1  ;;  %v1649_v39 = vpop.f32.mrf.mxu0 }
 0x162   : > { %1855 = vst [vmem:[%s3045_s8 + $0x38] sm:$0xff] %v1791_v44  ;;  %v1792_v35 = vmax.f32 %v1646_v32, 0.0  ;;  %v1648_v47 = vadd.f32 %v1647_v23, %v1455_v57  ;;  %v1457_v51 = vadd.f32 %v1456_v21, %v1264_v56 }
 0x163   : > { %v1458_v18 = vpop.f32.mrf.mxu1  ;;  %v1651_v2 = vpop.f32.mrf.mxu0 }
 0x164   : > { %1856 = vst [vmem:[%s3045_s8 + $0x40] sm:$0xff] %v1792_v35  ;;  %v1793_v38 = vmax.f32 %v1648_v47, 0.0  ;;  %v1650_v33 = vadd.f32 %v1649_v39, %v1457_v51  ;;  %v1459_v50 = vadd.f32 %v1458_v18, %v1266_v59 }
 0x165   : > { %v1462_v42 = vpop.f32.mrf.mxu1  ;;  %v1655_v15 = vpop.f32.mrf.mxu0 }
 0x166   : > { %1857 = vst [vmem:[%s3045_s8 + $0x48] sm:$0xff] %v1793_v38  ;;  %v1794_v12 = vmax.f32 %v1650_v33, 0.0  ;;  %v1652_v5 = vadd.f32 %v1651_v2, %v1459_v50  ;;  %v1463_v14 = vadd.f32 %v1462_v42, %v1270_v62 }
 0x167   : > { %v1464_v53 = vpop.f32.mrf.mxu1  ;;  %v1657_v41 = vpop.f32.mrf.mxu0 }
 0x168   : > { %1858 = vst [vmem:[%s3045_s8 + $0x50] sm:$0xff] %v1794_v12  ;;  %v1795_v24 = vmax.f32 %v1652_v5, 0.0  ;;  %v1656_v27 = vadd.f32 %v1655_v15, %v1463_v14  ;;  %v1465_v60 = vadd.f32 %v1464_v53, %v1272_v1 }
 0x169   : > { %v1466_v23 = vpop.f32.mrf.mxu1  ;;  %v1659_v56 = vpop.f32.mrf.mxu0 }
 0x16a   : > { %1859 = vst [vmem:[%s3045_s8 + $0x58] sm:$0xff] %v1795_v24  ;;  %v1796_v44 = vmax.f32 %v1656_v27, 0.0  ;;  %v1658_v32 = vadd.f32 %v1657_v41, %v1465_v60  ;;  %v1467_v57 = vadd.f32 %v1466_v23, %v1274_v4 }
 0x16b   : > { %v1468_v21 = vpop.f32.mrf.mxu1  ;;  %v1661_v39 = vpop.f32.mrf.mxu0 }
 0x16c   : > { %1860 = vst [vmem:[%s3045_s8 + $0x60] sm:$0xff] %v1796_v44  ;;  %v1797_v59 = vmax.f32 %v1658_v32, 0.0  ;;  %v1660_v35 = vadd.f32 %v1659_v56, %v1467_v57  ;;  %v1469_v47 = vadd.f32 %v1468_v21, %v1276_v7 }
 0x16d   : > { %v1472_v51 = vpop.f32.mrf.mxu1  ;;  %v1665_v18 = vpop.f32.mrf.mxu0 }
 0x16e   : > { %1861 = vst [vmem:[%s3045_s8 + $0x68] sm:$0xff] %v1797_v59  ;;  %v1798_v2 = vmax.f32 %v1660_v35, 0.0  ;;  %v1662_v62 = vadd.f32 %v1661_v39, %v1469_v47  ;;  %v1473_v38 = vadd.f32 %v1472_v51, %v1280_v10 }
 0x16f   : > { %v1474_v33 = vpop.f32.mrf.mxu1  ;;  %v1667_v50 = vpop.f32.mrf.mxu0 }
 0x170   : > { %1862 = vst [vmem:[%s3045_s8 + $0x70] sm:$0xff] %v1798_v2  ;;  %v1799_v42 = vmax.f32 %v1662_v62, 0.0  ;;  %v1666_v15 = vadd.f32 %v1665_v18, %v1473_v38  ;;  %v1475_v1 = vadd.f32 %v1474_v33, %v1282_v13 }
 0x171   : > { %v1476_v12 = vpop.f32.mrf.mxu1  ;;  %v1669_v5 = vpop.f32.mrf.mxu0 }
 0x172   : > { %1863 = vst [vmem:[%s3045_s8 + $0x78] sm:$0xff] %v1799_v42  ;;  %v1800_v14 = vmax.f32 %v1666_v15, 0.0  ;;  %v1668_v53 = vadd.f32 %v1667_v50, %v1475_v1  ;;  %v1477_v41 = vadd.f32 %v1476_v12, %v1284_v16 }
 0x173   : > { %v1478_v4 = vpop.f32.mrf.mxu1  ;;  %v1671_v24 = vpop.f32.mrf.mxu0 }
 0x174   : > { %1864 = vst [vmem:[%s3045_s8 + $0x80] sm:$0xff] %v1800_v14  ;;  %v1801_v27 = vmax.f32 %v1668_v53, 0.0  ;;  %v1670_v60 = vadd.f32 %v1669_v5, %v1477_v41  ;;  %v1479_v23 = vadd.f32 %v1478_v4, %v1286_v19 }
 0x175   : > { %v1482_v56 = vpop.f32.mrf.mxu1  ;;  %v1675_v7 = vpop.f32.mrf.mxu0 }
 0x176   : > { %1865 = vst [vmem:[%s3045_s8 + $0x88] sm:$0xff] %v1801_v27  ;;  %v1802_v44 = vmax.f32 %v1670_v60, 0.0  ;;  %v1672_v32 = vadd.f32 %v1671_v24, %v1479_v23  ;;  %v1483_v57 = vadd.f32 %v1482_v56, %v1290_v22 }
 0x177   : > { %v1484_v21 = vpop.f32.mrf.mxu1  ;;  %v1677_v39 = vpop.f32.mrf.mxu0 }
 0x178   : > { %1866 = vst [vmem:[%s3045_s8 + $0x90] sm:$0xff] %v1802_v44  ;;  %v1803_v10 = vmax.f32 %v1672_v32, 0.0  ;;  %v1676_v59 = vadd.f32 %v1675_v7, %v1483_v57  ;;  %v1485_v35 = vadd.f32 %v1484_v21, %v1292_v25 }
 0x179   : > { %v1486_v47 = vpop.f32.mrf.mxu1  ;;  %v1679_v51 = vpop.f32.mrf.mxu0 }
 0x17a   : > { %1867 = vst [vmem:[%s3045_s8 + $0x98] sm:$0xff] %v1803_v10  ;;  %v1804_v18 = vmax.f32 %v1676_v59, 0.0  ;;  %v1678_v13 = vadd.f32 %v1677_v39, %v1485_v35  ;;  %v1487_v2 = vadd.f32 %v1486_v47, %v1294_v28 }
 0x17b   : > { %v1488_v62 = vpop.f32.mrf.mxu1  ;;  %v1681_v38 = vpop.f32.mrf.mxu0 }
 0x17c   : > { %1868 = vst [vmem:[%s3045_s8 + $0xa0] sm:$0xff] %v1804_v18  ;;  %v1805_v33 = vmax.f32 %v1678_v13, 0.0  ;;  %v1680_v50 = vadd.f32 %v1679_v51, %v1487_v2  ;;  %v1489_v16 = vadd.f32 %v1488_v62, %v1296_v36 }
 0x17d   : > { %v1492_v42 = vpop.f32.mrf.mxu1  ;;  %v1685_v15 = vpop.f32.mrf.mxu0 }
 0x17e   : > { %1869 = vst [vmem:[%s3045_s8 + $0xa8] sm:$0xff] %v1805_v33  ;;  %v1806_v1 = vmax.f32 %v1680_v50, 0.0  ;;  %v1682_v12 = vadd.f32 %v1681_v38, %v1489_v16  ;;  %v1493_v5 = vadd.f32 %v1492_v42, %v1300_v45 }
 0x17f   : > { %v1494_v19 = vpop.f32.mrf.mxu1  ;;  %v1687_v14 = vpop.f32.mrf.mxu0 }
 0x180   : > { %1870 = vst [vmem:[%s3045_s8 + $0xb0] sm:$0xff] %v1806_v1  ;;  %v1807_v53 = vmax.f32 %v1682_v12, 0.0  ;;  %v1686_v41 = vadd.f32 %v1685_v15, %v1493_v5  ;;  %v1495_v4 = vadd.f32 %v1494_v19, %v1302_v54 }
 0x181   : > { %v1496_v24 = vpop.f32.mrf.mxu1  ;;  %v1689_v22 = vpop.f32.mrf.mxu0 }
 0x182   : > { %1871 = vst [vmem:[%s3045_s8 + $0xb8] sm:$0xff] %v1807_v53  ;;  %v1808_v27 = vmax.f32 %v1686_v41, 0.0  ;;  %v1688_v60 = vadd.f32 %v1687_v14, %v1495_v4  ;;  %v1497_v23 = vadd.f32 %v1496_v24, %v1304_v63 }
 0x183   : > { %v1498_v56 = vpop.f32.mrf.mxu1  ;;  %v1691_v7 = vpop.f32.mrf.mxu0 }
 0x184   : > { %1872 = vst [vmem:[%s3045_s8 + $0xc0] sm:$0xff] %v1808_v27  ;;  %v1809_v25 = vmax.f32 %v1688_v60, 0.0  ;;  %v1690_v44 = vadd.f32 %v1689_v22, %v1497_v23  ;;  %v1499_v32 = vadd.f32 %v1498_v56, %v1306_v8 }
 0x185   : > { %v1502_v57 = vpop.f32.mrf.mxu1  ;;  %v1695_v21 = vpop.f32.mrf.mxu0 }
 0x186   : > { %1873 = vst [vmem:[%s3045_s8 + $0xc8] sm:$0xff] %v1809_v25  ;;  %v1810_v39 = vmax.f32 %v1690_v44, 0.0  ;;  %v1692_v28 = vadd.f32 %v1691_v7, %v1499_v32  ;;  %v1503_v10 = vadd.f32 %v1502_v57, %v1310_v17 }
 0x187   : > { %v1504_v59 = vpop.f32.mrf.mxu1  ;;  %v1697_v35 = vpop.f32.mrf.mxu0 }
 0x188   : > { %1874 = vst [vmem:[%s3045_s8 + $0xd0] sm:$0xff] %v1810_v39  ;;  %v1811_v47 = vmax.f32 %v1692_v28, 0.0  ;;  %v1696_v51 = vadd.f32 %v1695_v21, %v1503_v10  ;;  %v1505_v36 = vadd.f32 %v1504_v59, %v1312_v26 }
 0x189   : > { %v1506_v18 = vpop.f32.mrf.mxu1  ;;  %v1699_v13 = vpop.f32.mrf.mxu0 }
 0x18a   : > { %1875 = vst [vmem:[%s3045_s8 + $0xd8] sm:$0xff] %v1811_v47  ;;  %v1812_v2 = vmax.f32 %v1696_v51, 0.0  ;;  %v1698_v62 = vadd.f32 %v1697_v35, %v1505_v36  ;;  %v1507_v38 = vadd.f32 %v1506_v18, %v1314_v48 }
 0x18b   : > { %v1508_v45 = vpop.f32.mrf.mxu1  ;;  %v1701_v33 = vpop.f32.mrf.mxu0 }
 0x18c   : > { %1876 = vst [vmem:[%s3045_s8 + $0xe0] sm:$0xff] %v1812_v2  ;;  %v1813_v50 = vmax.f32 %v1698_v62, 0.0  ;;  %v1700_v30 = vadd.f32 %v1699_v13, %v1507_v38  ;;  %v1509_v20 = vadd.f32 %v1508_v45, %v1316_v11 }
 0x18d   : > { %v1512_v16 = vpop.f32.mrf.mxu1  ;;  %v1705_v42 = vpop.f32.mrf.mxu0 }
 0x18e   : > { %1877 = vst [vmem:[%s3045_s8 + $0xe8] sm:$0xff] %v1813_v50  ;;  %v1814_v15 = vmax.f32 %v1700_v30, 0.0  ;;  %v1702_v54 = vadd.f32 %v1701_v33, %v1509_v20  ;;  %v1513_v31 = vadd.f32 %v1512_v16, %v2878_v34 }
 0x18f   : > { %v1514_v29 = vpop.f32.mrf.mxu1  ;;  %v1707_v1 = vpop.f32.mrf.mxu0 }
 0x190   : > { %1878 = vst [vmem:[%s3045_s8 + $0xf0] sm:$0xff] %v1814_v15  ;;  %v1815_v12 = vmax.f32 %v1702_v54, 0.0  ;;  %v1706_v5 = vadd.f32 %v1705_v42, %v1513_v31  ;;  %v1515_v19 = vadd.f32 %v1514_v29, %v2883_v37 }
 0x191   : > { %v1516_v14 = vpop.f32.mrf.mxu1  ;;  %v1709_v63 = vpop.f32.mrf.mxu0 }
 0x192   : > { %1879 = vst [vmem:[%s3045_s8 + $0xf8] sm:$0xff] %v1815_v12  ;;  %v1816_v53 = vmax.f32 %v1706_v5, 0.0  ;;  %v1708_v41 = vadd.f32 %v1707_v1, %v1515_v19  ;;  %v1517_v4 = vadd.f32 %v1516_v14, %v2888_v40 }
 0x193   : > { %v1518_v24 = vpop.f32.mrf.mxu1  ;;  %v1711_v22 = vpop.f32.mrf.mxu0 }
 0x194   : > { %1880 = vst [vmem:[%s3045_s8 + $0x100] sm:$0xff] %v1816_v53  ;;  %v1817_v34 = vmax.f32 %v1708_v41, 0.0  ;;  %v1710_v8 = vadd.f32 %v1709_v63, %v1517_v4  ;;  %v1519_v27 = vadd.f32 %v1518_v24, %v2893_v43  ;;  %v3232_v53 = vld [vmem:[#allocation2_spill] sm:$0xff] }
 0x195   : > { %v1522_v60 = vpop.f32.mrf.mxu1  ;;  %v1715_v23 = vpop.f32.mrf.mxu0 }
 0x196   : > { %1881 = vst [vmem:[%s3045_s8 + $0x108] sm:$0xff] %v1817_v34  ;;  %v1818_v37 = vmax.f32 %v1710_v8, 0.0  ;;  %v1712_v56 = vadd.f32 %v1711_v22, %v1519_v27  ;;  %v1523_v7 = vadd.f32 %v1522_v60, %v2898_v46  ;;  %v3233_v34 = vld [vmem:[#allocation3_spill] sm:$0xff] }
 0x197   : > { %v1524_v17 = vpop.f32.mrf.mxu1  ;;  %v1717_v25 = vpop.f32.mrf.mxu0 }
 0x198   : > { %1882 = vst [vmem:[%s3045_s8 + $0x110] sm:$0xff] %v1818_v37  ;;  %v1819_v40 = vmax.f32 %v1712_v56, 0.0  ;;  %v1716_v44 = vadd.f32 %v1715_v23, %v1523_v7  ;;  %v1525_v32 = vadd.f32 %v1524_v17, %v2903_v49  ;;  %v3234_v37 = vld [vmem:[#allocation4_spill] sm:$0xff] }
 0x199   : > { %v1526_v57 = vpop.f32.mrf.mxu1  ;;  %v1719_v21 = vpop.f32.mrf.mxu0 }
 0x19a   : > { %1883 = vst [vmem:[%s3045_s8 + $0x118] sm:$0xff] %v1819_v40  ;;  %v1820_v43 = vmax.f32 %v1716_v44, 0.0  ;;  %v1718_v26 = vadd.f32 %v1717_v25, %v1525_v32  ;;  %v1527_v39 = vadd.f32 %v1526_v57, %v2908_v52  ;;  %v3235_v44 = vld [vmem:[#allocation5_spill] sm:$0xff] }
 0x19b   : > { %v1528_v28 = vpop.f32.mrf.mxu1  ;;  %v1721_v10 = vpop.f32.mrf.mxu0 }
 0x19c   : > { %1884 = vst [vmem:[%s3045_s8 + $0x120] sm:$0xff] %v1820_v43  ;;  %v1821_v46 = vmax.f32 %v1718_v26, 0.0  ;;  %v1720_v59 = vadd.f32 %v1719_v21, %v1527_v39  ;;  %v1529_v35 = vadd.f32 %v1528_v28, %v2913_v55  ;;  %v3236_v39 = vld [vmem:[#allocation6_spill] sm:$0xff] }
 0x19d   : > { %v1532_v48 = vpop.f32.mrf.mxu1  ;;  %v1725_v47 = vpop.f32.mrf.mxu0 }
 0x19e   : > { %1885 = vst [vmem:[%s3045_s8 + $0x128] sm:$0xff] %v1821_v46  ;;  %v1822_v49 = vmax.f32 %v1720_v59, 0.0  ;;  %v1722_v51 = vadd.f32 %v1721_v10, %v1529_v35  ;;  %v1533_v36 = vadd.f32 %v1532_v48, %v2918_v58  ;;  %v3237_v48 = vld [vmem:[#allocation7_spill] sm:$0xff] }
 0x19f   : > { %v1534_v18 = vpop.f32.mrf.mxu1  ;;  %v1727_v13 = vpop.f32.mrf.mxu0 }
 0x1a0   : > { %1886 = vst [vmem:[%s3045_s8 + $0x130] sm:$0xff] %v1822_v49  ;;  %v1823_v52 = vmax.f32 %v1722_v51, 0.0  ;;  %v1726_v11 = vadd.f32 %v1725_v47, %v1533_v36  ;;  %v1535_v2 = vadd.f32 %v1534_v18, %v2923_v61 }
 0x1a1   : > { %v1536_v62 = vpop.f32.mrf.mxu1  ;;  %v1729_v38 = vpop.f32.mrf.mxu0 }
 0x1a2   : > { %1887 = vst [vmem:[%s3045_s8 + $0x138] sm:$0xff] %v1823_v52  ;;  %v1824_v55 = vmax.f32 %v1726_v11, 0.0  ;;  %v1728_v45 = vadd.f32 %v1727_v13, %v1535_v2  ;;  %v1537_v33 = vadd.f32 %v1536_v62, %v2928_v0  ;;  %v3238_v13 = vld [vmem:[#allocation8_spill] sm:$0xff] }
 0x1a3   : > { %v1538_v50 = vpop.f32.mrf.mxu1  ;;  %v1731_v30 = vpop.f32.mrf.mxu0 }
 0x1a4   : > { %1888 = vst [vmem:[%s3045_s8 + $0x140] sm:$0xff] %v1824_v55  ;;  %v1825_v58 = vmax.f32 %v1728_v45, 0.0  ;;  %v1730_v20 = vadd.f32 %v1729_v38, %v1537_v33  ;;  %v1539_v16 = vadd.f32 %v1538_v50, %v2933_v3  ;;  %v3239_v55 = vld [vmem:[#allocation9_spill] sm:$0xff] }
 0x1a5   : > { %v1542_v42 = vpop.f32.mrf.mxu1  ;;  %v1735_v15 = vpop.f32.mrf.mxu0 }
 0x1a6   : > { %1889 = vst [vmem:[%s3045_s8 + $0x148] sm:$0xff] %v1825_v58  ;;  %v1826_v61 = vmax.f32 %v1730_v20, 0.0  ;;  %v1732_v54 = vadd.f32 %v1731_v30, %v1539_v16  ;;  %v1543_v31 = vadd.f32 %v1542_v42, %v2938_v6  ;;  %v3240_v20 = vld [vmem:[#allocation10_spill] sm:$0xff] }
 0x1a7   : > { %v1544_v29 = vpop.f32.mrf.mxu1  ;;  %v1737_v1 = vpop.f32.mrf.mxu0 }
 0x1a8   : > { %1890 = vst [vmem:[%s3045_s8 + $0x150] sm:$0xff] %v1826_v61  ;;  %v1827_v0 = vmax.f32 %v1732_v54, 0.0  ;;  %v1736_v12 = vadd.f32 %v1735_v15, %v1543_v31  ;;  %v1545_v5 = vadd.f32 %v1544_v29, %v2943_v9  ;;  %v3241_v31 = vld [vmem:[#allocation11_spill] sm:$0xff] }
 0x1a9   : > { %v1546_v19 = vpop.f32.mrf.mxu1  ;;  %v1739_v14 = vpop.f32.mrf.mxu0 }
 0x1aa   : > { %1891 = vst [vmem:[%s3045_s8 + $0x158] sm:$0xff] %v1827_v0  ;;  %v1828_v3 = vmax.f32 %v1736_v12, 0.0  ;;  %v1738_v63 = vadd.f32 %v1737_v1, %v1545_v5  ;;  %v1547_v41 = vadd.f32 %v1546_v19, %v3232_v53  ;;  %v3242_v19 = vld [vmem:[#allocation12_spill] sm:$0xff] }
 0x1ab   : > { %v1548_v4 = vpop.f32.mrf.mxu1  ;;  %v1741_v24 = vpop.f32.mrf.mxu0 }
 0x1ac   : > { %1892 = vst [vmem:[%s3045_s8 + $0x160] sm:$0xff] %v1828_v3  ;;  %v1829_v6 = vmax.f32 %v1738_v63, 0.0  ;;  %v1740_v22 = vadd.f32 %v1739_v14, %v1547_v41  ;;  %v1549_v8 = vadd.f32 %v1548_v4, %v3233_v34  ;;  %v3243_v4 = vld [vmem:[#allocation13_spill] sm:$0xff] }
 0x1ad   : > { %v1552_v27 = vpop.f32.mrf.mxu1  ;;  %v1745_v60 = vpop.f32.mrf.mxu0 }
 0x1ae   : > { %1893 = vst [vmem:[%s3045_s8 + $0x168] sm:$0xff] %v1829_v6  ;;  %v1830_v9 = vmax.f32 %v1740_v22, 0.0  ;;  %v1742_v23 = vadd.f32 %v1741_v24, %v1549_v8  ;;  %v1553_v56 = vadd.f32 %v1552_v27, %v3234_v37  ;;  %v3244_v27 = vld [vmem:[#allocation14_spill] sm:$0xff] }
 0x1af   : > { %v1554_v7 = vpop.f32.mrf.mxu1  ;;  %v1747_v17 = vpop.f32.mrf.mxu0 }
 0x1b0   : > { %1894 = vst [vmem:[%s3045_s8 + $0x170] sm:$0xff] %v1830_v9  ;;  %v1831_v25 = vmax.f32 %v1742_v23, 0.0  ;;  %v1746_v40 = vadd.f32 %v1745_v60, %v1553_v56  ;;  %v1555_v32 = vadd.f32 %v1554_v7, %v3235_v44  ;;  %v3245_v7 = vld [vmem:[#allocation15_spill] sm:$0xff] }
 0x1b1   : > { %v1556_v57 = vpop.f32.mrf.mxu1  ;;  %v1749_v21 = vpop.f32.mrf.mxu0 }
 0x1b2   : > { %1895 = vst [vmem:[%s3045_s8 + $0x178] sm:$0xff] %v1831_v25  ;;  %v1832_v43 = vmax.f32 %v1746_v40, 0.0  ;;  %v1748_v26 = vadd.f32 %v1747_v17, %v1555_v32  ;;  %v1557_v28 = vadd.f32 %v1556_v57, %v3236_v39  ;;  %v3246_v57 = vld [vmem:[#allocation16_spill] sm:$0xff] }
 0x1b3   : > { %v1558_v10 = vpop.f32.mrf.mxu1  ;;  %v1751_v46 = vpop.f32.mrf.mxu0 }
 0x1b4   : > { %1896 = vst [vmem:[%s3045_s8 + $0x180] sm:$0xff] %v1832_v43  ;;  %v1833_v59 = vmax.f32 %v1748_v26, 0.0  ;;  %v1750_v35 = vadd.f32 %v1749_v21, %v1557_v28  ;;  %v1559_v47 = vadd.f32 %v1558_v10, %v3237_v48  ;;  %v3247_v10 = vld [vmem:[#allocation17_spill] sm:$0xff] }
 0x1b5   : > { %v1562_v49 = vpop.f32.mrf.mxu1  ;;  %v1755_v51 = vpop.f32.mrf.mxu0 }
 0x1b6   : > { %1897 = vst [vmem:[%s3045_s8 + $0x188] sm:$0xff] %v1833_v59  ;;  %v1834_v36 = vmax.f32 %v1750_v35, 0.0  ;;  %v1752_v18 = vadd.f32 %v1751_v46, %v1559_v47  ;;  %v1563_v52 = vadd.f32 %v1562_v49, %v3238_v13  ;;  %v3248_v49 = vld [vmem:[#allocation18_spill] sm:$0xff] }
 0x1b7   : > { %v1564_v11 = vpop.f32.mrf.mxu1  ;;  %v1757_v2 = vpop.f32.mrf.mxu0 }
 0x1b8   : > { %1898 = vst [vmem:[%s3045_s8 + $0x190] sm:$0xff] %v1834_v36  ;;  %v1835_v62 = vmax.f32 %v1752_v18, 0.0  ;;  %v1756_v38 = vadd.f32 %v1755_v51, %v1563_v52  ;;  %v1565_v45 = vadd.f32 %v1564_v11, %v3239_v55  ;;  %v3249_v52 = vld [vmem:[#allocation19_spill] sm:$0xff] }
 0x1b9   : > { %v1566_v33 = vpop.f32.mrf.mxu1  ;;  %v1759_v50 = vpop.f32.mrf.mxu0 }
 0x1ba   : > { %1899 = vst [vmem:[%s3045_s8 + $0x198] sm:$0xff] %v1835_v62  ;;  %v1836_v30 = vmax.f32 %v1756_v38, 0.0  ;;  %v1758_v58 = vadd.f32 %v1757_v2, %v1565_v45  ;;  %v1567_v16 = vadd.f32 %v1566_v33, %v3240_v20 }
 0x1bb   : > { %v1568_v42 = vpop.f32.mrf.mxu1  ;;  %v1761_v15 = vpop.f32.mrf.mxu0 }
 0x1bc   : > { %1900 = vst [vmem:[%s3045_s8 + $0x1a0] sm:$0xff] %v1836_v30  ;;  %v1837_v61 = vmax.f32 %v1758_v58, 0.0  ;;  %v1760_v54 = vadd.f32 %v1759_v50, %v1567_v16  ;;  %v1569_v29 = vadd.f32 %v1568_v42, %v3241_v31 }
 0x1bd   : > { %v1572_v1 = vpop.f32.mrf.mxu1  ;;  %v1765_v0 = vpop.f32.mrf.mxu0 }
 0x1be   : > { %1901 = vst [vmem:[%s3045_s8 + $0x1a8] sm:$0xff] %v1837_v61  ;;  %v1838_v12 = vmax.f32 %v1760_v54, 0.0  ;;  %v1762_v5 = vadd.f32 %v1761_v15, %v1569_v29  ;;  %v1573_v14 = vadd.f32 %v1572_v1, %v3242_v19 }
 0x1bf   : > { %v1574_v3 = vpop.f32.mrf.mxu1  ;;  %v1767_v63 = vpop.f32.mrf.mxu0 }
 0x1c0   : > { %1902 = vst [vmem:[%s3045_s8 + $0x1b0] sm:$0xff] %v1838_v12  ;;  %v1839_v53 = vmax.f32 %v1762_v5, 0.0  ;;  %v1766_v41 = vadd.f32 %v1765_v0, %v1573_v14  ;;  %v1575_v24 = vadd.f32 %v1574_v3, %v3243_v4 }
 0x1c1   : > { %v1576_v6 = vpop.f32.mrf.mxu1  ;;  %v1769_v22 = vpop.f32.mrf.mxu0 }
 0x1c2   : > { %1903 = vst [vmem:[%s3045_s8 + $0x1b8] sm:$0xff] %v1839_v53  ;;  %v1840_v34 = vmax.f32 %v1766_v41, 0.0  ;;  %v1768_v8 = vadd.f32 %v1767_v63, %v1575_v24  ;;  %v1577_v60 = vadd.f32 %v1576_v6, %v3244_v27 }
 0x1c3   : > { %v1578_v9 = vpop.f32.mrf.mxu1  ;;  %v1771_v23 = vpop.f32.mrf.mxu0 }
 0x1c4   : > { %1904 = vst [vmem:[%s3045_s8 + $0x1c0] sm:$0xff] %v1840_v34  ;;  %v1841_v37 = vmax.f32 %v1768_v8, 0.0  ;;  %v1770_v56 = vadd.f32 %v1769_v22, %v1577_v60  ;;  %v1579_v17 = vadd.f32 %v1578_v9, %v3245_v7 }
 0x1c5   : > { %v1582_v25 = vpop.f32.mrf.mxu1  ;;  %v1775_v40 = vpop.f32.mrf.mxu0 }
 0x1c6   : > { %1905 = vst [vmem:[%s3045_s8 + $0x1c8] sm:$0xff] %v1841_v37  ;;  %v1842_v44 = vmax.f32 %v1770_v56, 0.0  ;;  %v1772_v32 = vadd.f32 %v1771_v23, %v1579_v17  ;;  %v1583_v21 = vadd.f32 %v1582_v25, %v3246_v57 }
 0x1c7   : > { %v1584_v43 = vpop.f32.mrf.mxu1  ;;  %v1777_v26 = vpop.f32.mrf.mxu0 }
 0x1c8   : > { %1906 = vst [vmem:[%s3045_s8 + $0x1d0] sm:$0xff] %v1842_v44  ;;  %v1843_v39 = vmax.f32 %v1772_v32, 0.0  ;;  %v1776_v28 = vadd.f32 %v1775_v40, %v1583_v21  ;;  %v1585_v46 = vadd.f32 %v1584_v43, %v3247_v10 }
 0x1c9   : > { %v1586_v59 = vpop.f32.mrf.mxu1  ;;  %v1779_v35 = vpop.f32.mrf.mxu0 }
 0x1ca   : > { %1907 = vst [vmem:[%s3045_s8 + $0x1d8] sm:$0xff] %v1843_v39  ;;  %v1844_v48 = vmax.f32 %v1776_v28, 0.0  ;;  %v1778_v47 = vadd.f32 %v1777_v26, %v1585_v46  ;;  %v1587_v51 = vadd.f32 %v1586_v59, %v3248_v49 }
 0x1cb   : > { %v1588_v36 = vpop.f32.mrf.mxu1  ;;  %v1781_v2 = vpop.f32.mrf.mxu0 }
 0x1cc   : > { %1908 = vst [vmem:[%s3045_s8 + $0x1e0] sm:$0xff] %v1844_v48  ;;  %v1845_v18 = vmax.f32 %v1778_v47, 0.0  ;;  %v1780_v13 = vadd.f32 %v1779_v35, %v1587_v51  ;;  %v1589_v11 = vadd.f32 %v1588_v36, %v3249_v52 }
 0x1ce   : > { %1909 = vst [vmem:[%s3045_s8 + $0x1e8] sm:$0xff] %v1845_v18  ;;  %v1846_v62 = vmax.f32 %v1780_v13, 0.0  ;;  %v1782_v38 = vadd.f32 %v1781_v2, %v1589_v11 }
 0x1d0   : > { %1910 = vst [vmem:[%s3045_s8 + $0x1f0] sm:$0xff] %v1846_v62  ;;  %v1847_v55 = vmax.f32 %v1782_v38, 0.0 }
 0x1d2   : > { %1911 = vst [vmem:[%s3045_s8 + $0x1f8] sm:$0xff] %v1847_v55 }
 0x1d3 PF: > { %s13_s14 = sadd.s32 1, %s2487_s14   ;;  %s3250_s12 = smov %s2483_s13 }
 0x1d4   : > { %p10_p5 = scmp.ge.s32.totalorder %s13_s14, 4   ;;  %s3251_s13 = smov %s3253_s15 }
 0x1d6   :  { %12 = sbr.rel (!%p10_p5) target bundleno = 2 (0x2), region = 62 }

</bundles_post_ra>
